<compile_context>
chip_gen: v7x
topology: tpu7x:2x2x1
jax: 0.10.0
libtpu: 0.0.40
codegen_flags: <defaults>
</compile_context>

<pallas_src>
import functools
import math

import jax
import jax.numpy as jnp
from jax import lax
from jax.experimental import pallas as pl
from jax.experimental.pallas import tpu as pltpu


# ------------------------------- Pallas kernel ------------------------------- #

def updown_kernel(x_ref, v_ref, st_ref,
                  wi_ref, bi_ref, wh_ref, bh_ref,
                  w1v_ref, b1_ref, whq5_ref, b5_ref,
                  wl1_ref, bl1_ref,
                  w3_ref, b3_ref, w7_ref, b7_ref,
                  w9_ref, b9_ref,
                  out_ref, *, T, B, R, H, Dv):
    """Fused GRU recurrence + attention/gated-tanh head for the full batch.

    x_ref   : (T*B, E) time-major embedded tokens (row t*B+b = token t, batch b).
    v_ref   : (B*R, Dv) flattened image regions (batch-major).
    st_ref  : (B, B*R) segmented-reduce selector (regions -> batch).
    GRU weights fused [r|z|n] -> (in, 3H); GatedTanh pairs fused [tanh|sig]
    -> (in, 2H); whq5 = [w1q | w5] (H, 4H); w9/b9 zero-padded to 128 lanes.
    """
    def dot(a, b):
        return jnp.dot(a, b, preferred_element_type=jnp.float32)

    def gated(z):                           # z: (n, 2H) -> (n, H)
        return jnp.tanh(z[:, :H]) * jax.nn.sigmoid(z[:, H:])

    # ------------------------------- GRU ------------------------------------ #
    # Hoisted input projection: one big matmul for all timesteps.
    gi_all = dot(x_ref[...], wi_ref[...]) + bi_ref[...]      # (T*B, 3H)
    wh = wh_ref[...]
    bh = bh_ref[...]

    # TODO(synk): hold wh in MXU weight regs across the unroll via
    # pltpu.matmul_push_rhs/matmul_acc_lhs/matmul_pop once semantics are pinned;
    # kept as jnp.dot for guaranteed lowering at these toy shapes.
    h = jnp.zeros((B, H), jnp.float32)
    for t in range(T):                       # static, fully unrolled
        # TODO(synk): if T*B grows, read per-step gates from a VMEM scratch ref
        # (pl.ds + pl.multiple_of) to bound live ranges instead of value slices.
        gi = gi_all[t * B:(t + 1) * B, :]                    # (B, 3H)
        gh = dot(h, wh) + bh                                 # (B, 3H)
        rz = jax.nn.sigmoid(gi[:, :2 * H] + gh[:, :2 * H])   # one EUP launch
        r = rz[:, :H]
        z = rz[:, H:]
        n = jnp.tanh(gi[:, 2 * H:] + r * gh[:, 2 * H:])      # b_hn inside gh
        h = (1.0 - z) * n + z * h                            # (B, H)

    # ------------------------------- Head ------------------------------------ #
    # Fused post-GRU h-only matmul: columns [hq (2H) | g3 input (2H)] = 128 lanes.
    h4 = dot(h, whq5_ref[...])                               # (B, 4H)
    hq = h4[:, :2 * H]                                       # g1 h-contribution
    h2 = gated(h4[:, 2 * H:] + b5_ref[...])                  # (B, H) = g3(h)

    Vf = v_ref[...]                                          # (B*R, Dv)

    # Broadcast hq over each batch's R regions (sublane replicate, no selector
    # matmul): per-batch row broadcast + concat keeps everything 2-D and cheap.
    hq_rep = jnp.concatenate(
        [jnp.broadcast_to(hq[b:b + 1, :], (R, 2 * H)) for b in range(B)], axis=0)
    z1 = dot(Vf, w1v_ref[...]) + hq_rep + b1_ref[...]        # (B*R, 2H)
    X1 = gated(z1)                                           # (B*R, H)

    # l1 as a lane reduction (no 1-wide MXU matmul), un-normalized softmax.
    att = jnp.sum(X1 * wl1_ref[...], axis=-1, keepdims=True) + bl1_ref[...]
    att = att - jnp.max(att, axis=0, keepdims=True)          # global max: cancels
    e = jnp.exp(att)                                         # (B*R, 1)

    # One fused segmented reduce: [sum(V*e) | sum(e)] per batch item.
    num_den = dot(st_ref[...], jnp.concatenate([Vf * e, e], axis=1))  # (B, Dv+1)
    Vw = num_den[:, :Dv] * pl.reciprocal(num_den[:, Dv:])    # exact reciprocal

    # g2(Vw) -> * g3(h) -> g4 -> l2 (lane-dense padded classifier).
    v2 = gated(dot(Vw, w3_ref[...]) + b3_ref[...])           # (B, H)
    x2 = h2 * v2
    x3 = gated(dot(x2, w7_ref[...]) + b7_ref[...])           # (B, H)
    out_ref[...] = dot(x3, w9_ref[...]) + b9_ref[...]        # (B, 128) dense store


# ------------------------------- Host wrapper -------------------------------- #

def updown_forward(V, Q_tokens, kp, *, label_size):
    """kp: dict of fused kernel-layout parameters (see init_params)."""
    B, R, Dv = V.shape
    T = Q_tokens.shape[1]
    H = kp["wh"].shape[0]
    out_pad = kp["w9"].shape[1]

    # Embedding lookup (gather glue) + time-major flatten for the hoisted matmul.
    x = jnp.take(kp["emb"], Q_tokens, axis=0)                # (B, T, E)
    x = jnp.transpose(x, (1, 0, 2)).reshape(T * B, -1).astype(jnp.float32)

    V_flat = V.reshape(B * R, Dv).astype(jnp.float32)
    # Segmented-reduce selector only (the broadcast selector S is gone).
    # Trace-time constant under jit; XLA folds it, no per-call rebuild.
    ST = jnp.transpose(jnp.repeat(jnp.eye(B, dtype=jnp.float32), R, axis=0))

    args = (x, V_flat, ST,
            kp["wi"], kp["bi"], kp["wh"], kp["bh"],
            kp["w1v"], kp["b1"], kp["whq5"], kp["b5"],
            kp["wl1"], kp["bl1"],
            kp["w3"], kp["b3"], kp["w7"], kp["b7"],
            kp["w9"], kp["b9"])

    # Whole problem fits comfortably in VMEM at these sizes -> single invocation,
    # everything resident (no grid, no per-step DMA bookkeeping).
    # TODO(synk): at production sizes, tile over batch (and B*R for V) with
    # BlockSpecs + dimension_semantics=("parallel",) (v7x: 2 TCs, 64 MiB VMEM),
    # and cast MXU inputs to bf16 with f32 accumulation.
    out = pl.pallas_call(
        functools.partial(updown_kernel, T=T, B=B, R=R, H=H, Dv=Dv),
        out_shape=jax.ShapeDtypeStruct((B, out_pad), jnp.float32),
        in_specs=[pl.BlockSpec(memory_space=pltpu.MemorySpace.VMEM)] * len(args),
        out_specs=pl.BlockSpec(memory_space=pltpu.MemorySpace.VMEM),
    )(*args)
    return out[:, :label_size]


# --------------------------- Parameter construction -------------------------- #

def _uniform(key, shape, bound):
    return jax.random.uniform(key, shape, jnp.float32, -bound, bound)


def _linear(key, in_f, out_f):
    k1, k2 = jax.random.split(key)
    bound = 1.0 / math.sqrt(in_f)
    return _uniform(k1, (out_f, in_f), bound), _uniform(k2, (out_f,), bound)


def init_params(key, embed_size, hidden_size, img_vec_size, label_size,
                token_size, pad_index):
    ks = jax.random.split(key, 16)
    H, E, Dv = hidden_size, embed_size, img_vec_size

    # nn.Embedding (pad row zeroed at init, as PyTorch does)
    emb = jax.random.normal(ks[0], (token_size, E), jnp.float32)
    emb = emb.at[pad_index].set(0.0)

    # nn.GRU (torch layout: weight_ih_l0 (3H,E), weight_hh_l0 (3H,H), biases (3H,))
    gb = 1.0 / math.sqrt(H)
    w_ih = _uniform(ks[1], (3 * H, E), gb)
    w_hh = _uniform(ks[2], (3 * H, H), gb)
    b_ih = _uniform(ks[3], (3 * H,), gb)
    b_hh = _uniform(ks[4], (3 * H,), gb)

    # GatedTanh / Linear layers (torch layout (out, in))
    g1a_w, g1a_b = _linear(ks[5], H + Dv, H)
    g1b_w, g1b_b = _linear(ks[6], H + Dv, H)
    l1_w, l1_b = _linear(ks[7], H, 1)
    g2a_w, g2a_b = _linear(ks[8], Dv, H)
    g2b_w, g2b_b = _linear(ks[9], Dv, H)
    g3a_w, g3a_b = _linear(ks[10], H, H)
    g3b_w, g3b_b = _linear(ks[11], H, H)
    g4a_w, g4a_b = _linear(ks[12], H, H)
    g4b_w, g4b_b = _linear(ks[13], H, H)
    l2_w, l2_b = _linear(ks[14], H, label_size)

    torch_params = dict(
        emb=emb, w_ih=w_ih, w_hh=w_hh, b_ih=b_ih, b_hh=b_hh,
        g1a_w=g1a_w, g1a_b=g1a_b, g1b_w=g1b_w, g1b_b=g1b_b,
        l1_w=l1_w, l1_b=l1_b,
        g2a_w=g2a_w, g2a_b=g2a_b, g2b_w=g2b_w, g2b_b=g2b_b,
        g3a_w=g3a_w, g3a_b=g3a_b, g3b_w=g3b_w, g3b_b=g3b_b,
        g4a_w=g4a_w, g4a_b=g4a_b, g4b_w=g4b_w, g4b_b=g4b_b,
        l2_w=l2_w, l2_b=l2_b,
    )

    def fuse_gt(wa, ba, wb, bb):
        # GatedTanh pair -> right-multiply (in, 2H): [tanh half | sigmoid half].
        return (jnp.concatenate([wa.T, wb.T], axis=1),
                jnp.concatenate([ba, bb]).reshape(1, -1))

    w1, b1 = fuse_gt(g1a_w, g1a_b, g1b_w, g1b_b)             # (Dv+H, 2H)
    w3, b3 = fuse_gt(g2a_w, g2a_b, g2b_w, g2b_b)             # (Dv, 2H)
    w5, b5 = fuse_gt(g3a_w, g3a_b, g3b_w, g3b_b)             # (H, 2H)
    w7, b7 = fuse_gt(g4a_w, g4a_b, g4b_w, g4b_b)             # (H, 2H)

    # Lane-dense padded classifier: (H, 128k) weight, (1, 128k) bias, zeros ride
    # along in the padded lanes and are sliced off in the wrapper.
    lane_pad = max(128, ((label_size + 127) // 128) * 128)
    w9p = jnp.zeros((H, lane_pad), jnp.float32).at[:, :label_size].set(l2_w.T)
    b9p = jnp.zeros((1, lane_pad), jnp.float32).at[:, :label_size].set(l2_b)

    kernel_params = dict(
        emb=emb,
        # Fused GRU: right-multiply (in, 3H) with columns [r|z|n], biases (1,3H).
        wi=w_ih.T, bi=b_ih.reshape(1, 3 * H),
        wh=w_hh.T, bh=b_hh.reshape(1, 3 * H),
        # g1 split: first Dv torch-input columns hit V, remaining H hit repeated h.
        w1v=w1[:Dv, :], b1=b1,
        # Post-GRU h-only fused weight: [w1q | w5] -> (H, 4H) = 128 lanes.
        whq5=jnp.concatenate([w1[Dv:, :], w5], axis=1), b5=b5,
        wl1=l1_w,                       # (1, H) row used as a lane reduction
        bl1=l1_b.reshape(1, 1),
        w3=w3, b3=b3, w7=w7, b7=b7,
        w9=w9p, b9=b9p,
    )
    return torch_params, kernel_params


# ----------------------------- Pure-JAX reference ----------------------------- #

def ref_forward(V, Q_tokens, tp, hidden_size):
    H = hidden_size

    def lin(x, w, b):
        return x @ w.T + b

    x = jnp.take(tp["emb"], Q_tokens, axis=0)                # (B, T, E)
    B, T, _ = x.shape
    h = jnp.zeros((B, H), jnp.float32)
    for t in range(T):
        x_t = x[:, t, :]
        gi = x_t @ tp["w_ih"].T + tp["b_ih"]
        gh = h @ tp["w_hh"].T + tp["b_hh"]
        r = jax.nn.sigmoid(gi[:, :H] + gh[:, :H])
        z = jax.nn.sigmoid(gi[:, H:2 * H] + gh[:, H:2 * H])
        n = jnp.tanh(gi[:, 2 * H:] + r * gh[:, 2 * H:])
        h = (1.0 - z) * n + z * h

    Qrep = jnp.repeat(h[:, None, :], V.shape[1], axis=1)
    X = jnp.concatenate((V, Qrep), axis=2)
    X = jnp.tanh(lin(X, tp["g1a_w"], tp["g1a_b"])) * jax.nn.sigmoid(
        lin(X, tp["g1b_w"], tp["g1b_b"]))
    X = lin(X, tp["l1_w"], tp["l1_b"])
    X = jax.nn.softmax(X, axis=1)
    Vw = (V * X).sum(axis=1)
    Vw = jnp.tanh(lin(Vw, tp["g2a_w"], tp["g2a_b"])) * jax.nn.sigmoid(
        lin(Vw, tp["g2b_w"], tp["g2b_b"]))
    h2 = jnp.tanh(lin(h, tp["g3a_w"], tp["g3a_b"])) * jax.nn.sigmoid(
        lin(h, tp["g3b_w"], tp["g3b_b"]))
    X = h2 * Vw
    X = jnp.tanh(lin(X, tp["g4a_w"], tp["g4a_b"])) * jax.nn.sigmoid(
        lin(X, tp["g4b_w"], tp["g4b_b"]))
    return lin(X, tp["l2_w"], tp["l2_b"])


# ------------------------------------ Main ------------------------------------ #

if __name__ == "__main__":
    embed_size, hidden_size = 16, 32
    img_vec_size, label_size = 16, 10
    token_size, pad_index = 50, 0
    B, R, T = 2, 8, 8

    root = jax.random.PRNGKey(0)
    k_param, k_v, k_q = jax.random.split(root, 3)
    torch_params, kernel_params = init_params(
        k_param, embed_size, hidden_size, img_vec_size, label_size,
        token_size, pad_index)

    V = jax.random.normal(k_v, (B, R, img_vec_size), jnp.float32)
    Q = jax.random.randint(k_q, (B, T), 0, token_size, jnp.int32)

    fwd = jax.jit(functools.partial(updown_forward, label_size=label_size))
    out = jax.block_until_ready(fwd(V, Q, kernel_params))

    ref = ref_forward(V, Q, torch_params, hidden_size)
    assert out.shape == (B, label_size)
    assert jnp.allclose(out, ref, atol=1e-4, rtol=1e-4), (
        f"mismatch: max abs err = {jnp.max(jnp.abs(out - ref))}")

    print("KERNEL_OK")
</pallas_src>

<mosaic_0001>
module attributes {stable_mosaic.version = 11 : i64} {
  func.func @updown_kernel(%arg0: memref<16x16xf32, #tpu.memory_space<vmem>>, %arg1: memref<16x16xf32, #tpu.memory_space<vmem>>, %arg2: memref<2x16xf32, #tpu.memory_space<vmem>>, %arg3: memref<16x96xf32, #tpu.memory_space<vmem>>, %arg4: memref<1x96xf32, #tpu.memory_space<vmem>>, %arg5: memref<32x96xf32, #tpu.memory_space<vmem>>, %arg6: memref<1x96xf32, #tpu.memory_space<vmem>>, %arg7: memref<16x64xf32, #tpu.memory_space<vmem>>, %arg8: memref<1x64xf32, #tpu.memory_space<vmem>>, %arg9: memref<32x128xf32, #tpu.memory_space<vmem>>, %arg10: memref<1x64xf32, #tpu.memory_space<vmem>>, %arg11: memref<1x32xf32, #tpu.memory_space<vmem>>, %arg12: memref<1x1xf32, #tpu.memory_space<vmem>>, %arg13: memref<16x64xf32, #tpu.memory_space<vmem>>, %arg14: memref<1x64xf32, #tpu.memory_space<vmem>>, %arg15: memref<32x64xf32, #tpu.memory_space<vmem>>, %arg16: memref<1x64xf32, #tpu.memory_space<vmem>>, %arg17: memref<32x128xf32, #tpu.memory_space<vmem>>, %arg18: memref<1x128xf32, #tpu.memory_space<vmem>>, %arg19: memref<2x128xf32, #tpu.memory_space<vmem>>) attributes {dimension_semantics = [], scalar_prefetch = 0 : i64, scratch_operands = 0 : i64, tpu.core_type = #tpu.core_type<tc>} {
    %c0 = arith.constant 0 : index
    %c0_0 = arith.constant 0 : index
    %0 = vector.load %arg0[%c0, %c0_0] : memref<16x16xf32, #tpu.memory_space<vmem>>, vector<16x16xf32>
    %c0_1 = arith.constant 0 : index
    %c0_2 = arith.constant 0 : index
    %1 = vector.load %arg3[%c0_1, %c0_2] : memref<16x96xf32, #tpu.memory_space<vmem>>, vector<16x96xf32>
    %cst = arith.constant dense<0.000000e+00> : vector<16x96xf32>
    %2 = tpu.matmul %0, %1, %cst {dimension_numbers = #tpu.dot_dimension_numbers<[1], [0], [0], [1], [0, 0, 1, 1], [], []>} : vector<16x16xf32>, vector<16x96xf32>, vector<16x96xf32> -> vector<16x96xf32>
    %c0_3 = arith.constant 0 : index
    %c0_4 = arith.constant 0 : index
    %3 = vector.load %arg4[%c0_3, %c0_4] : memref<1x96xf32, #tpu.memory_space<vmem>>, vector<1x96xf32>
    %4 = vector.broadcast %3 : vector<1x96xf32> to vector<16x96xf32>
    %5 = arith.addf %2, %4 : vector<16x96xf32>
    %c0_5 = arith.constant 0 : index
    %c0_6 = arith.constant 0 : index
    %6 = vector.load %arg5[%c0_5, %c0_6] : memref<32x96xf32, #tpu.memory_space<vmem>>, vector<32x96xf32>
    %c0_7 = arith.constant 0 : index
    %c0_8 = arith.constant 0 : index
    %7 = vector.load %arg6[%c0_7, %c0_8] : memref<1x96xf32, #tpu.memory_space<vmem>>, vector<1x96xf32>
    %cst_9 = arith.constant 0.000000e+00 : f32
    %8 = vector.broadcast %cst_9 : f32 to vector<2x32xf32>
    %9 = vector.extract_strided_slice %5 {offsets = [0, 0], sizes = [2, 96], strides = [1, 1]} : vector<16x96xf32> to vector<2x96xf32>
    %cst_10 = arith.constant dense<0.000000e+00> : vector<2x96xf32>
    %10 = tpu.matmul %8, %6, %cst_10 {dimension_numbers = #tpu.dot_dimension_numbers<[1], [0], [0], [1], [0, 0, 1, 1], [], []>} : vector<2x32xf32>, vector<32x96xf32>, vector<2x96xf32> -> vector<2x96xf32>
    %11 = vector.broadcast %7 : vector<1x96xf32> to vector<2x96xf32>
    %12 = arith.addf %10, %11 : vector<2x96xf32>
    %13 = vector.extract_strided_slice %9 {offsets = [0, 0], sizes = [2, 64], strides = [1, 1]} : vector<2x96xf32> to vector<2x64xf32>
    %14 = vector.extract_strided_slice %12 {offsets = [0, 0], sizes = [2, 64], strides = [1, 1]} : vector<2x96xf32> to vector<2x64xf32>
    %15 = arith.addf %13, %14 : vector<2x64xf32>
    %16 = arith.negf %15 : vector<2x64xf32>
    %17 = math.exp %16 : vector<2x64xf32>
    %cst_11 = arith.constant 1.000000e+00 : f32
    %18 = vector.broadcast %cst_11 : f32 to vector<2x64xf32>
    %19 = arith.addf %18, %17 : vector<2x64xf32>
    %20 = arith.divf %18, %19 : vector<2x64xf32>
    %21 = vector.extract_strided_slice %20 {offsets = [0, 0], sizes = [2, 32], strides = [1, 1]} : vector<2x64xf32> to vector<2x32xf32>
    %22 = vector.extract_strided_slice %20 {offsets = [0, 32], sizes = [2, 32], strides = [1, 1]} : vector<2x64xf32> to vector<2x32xf32>
    %23 = vector.extract_strided_slice %9 {offsets = [0, 64], sizes = [2, 32], strides = [1, 1]} : vector<2x96xf32> to vector<2x32xf32>
    %24 = vector.extract_strided_slice %12 {offsets = [0, 64], sizes = [2, 32], strides = [1, 1]} : vector<2x96xf32> to vector<2x32xf32>
    %25 = arith.mulf %21, %24 : vector<2x32xf32>
    %26 = arith.addf %23, %25 : vector<2x32xf32>
    %27 = math.tanh %26 : vector<2x32xf32>
    %cst_12 = arith.constant 1.000000e+00 : f32
    %28 = vector.broadcast %cst_12 : f32 to vector<2x32xf32>
    %29 = arith.subf %28, %22 : vector<2x32xf32>
    %30 = arith.mulf %29, %27 : vector<2x32xf32>
    %31 = arith.mulf %22, %8 : vector<2x32xf32>
    %32 = arith.addf %30, %31 : vector<2x32xf32>
    %33 = vector.extract_strided_slice %5 {offsets = [2, 0], sizes = [2, 96], strides = [1, 1]} : vector<16x96xf32> to vector<2x96xf32>
    %cst_13 = arith.constant dense<0.000000e+00> : vector<2x96xf32>
    %34 = tpu.matmul %32, %6, %cst_13 {dimension_numbers = #tpu.dot_dimension_numbers<[1], [0], [0], [1], [0, 0, 1, 1], [], []>} : vector<2x32xf32>, vector<32x96xf32>, vector<2x96xf32> -> vector<2x96xf32>
    %35 = vector.broadcast %7 : vector<1x96xf32> to vector<2x96xf32>
    %36 = arith.addf %34, %35 : vector<2x96xf32>
    %37 = vector.extract_strided_slice %33 {offsets = [0, 0], sizes = [2, 64], strides = [1, 1]} : vector<2x96xf32> to vector<2x64xf32>
    %38 = vector.extract_strided_slice %36 {offsets = [0, 0], sizes = [2, 64], strides = [1, 1]} : vector<2x96xf32> to vector<2x64xf32>
    %39 = arith.addf %37, %38 : vector<2x64xf32>
    %40 = arith.negf %39 : vector<2x64xf32>
    %41 = math.exp %40 : vector<2x64xf32>
    %cst_14 = arith.constant 1.000000e+00 : f32
    %42 = vector.broadcast %cst_14 : f32 to vector<2x64xf32>
    %43 = arith.addf %42, %41 : vector<2x64xf32>
    %44 = arith.divf %42, %43 : vector<2x64xf32>
    %45 = vector.extract_strided_slice %44 {offsets = [0, 0], sizes = [2, 32], strides = [1, 1]} : vector<2x64xf32> to vector<2x32xf32>
    %46 = vector.extract_strided_slice %44 {offsets = [0, 32], sizes = [2, 32], strides = [1, 1]} : vector<2x64xf32> to vector<2x32xf32>
    %47 = vector.extract_strided_slice %33 {offsets = [0, 64], sizes = [2, 32], strides = [1, 1]} : vector<2x96xf32> to vector<2x32xf32>
    %48 = vector.extract_strided_slice %36 {offsets = [0, 64], sizes = [2, 32], strides = [1, 1]} : vector<2x96xf32> to vector<2x32xf32>
    %49 = arith.mulf %45, %48 : vector<2x32xf32>
    %50 = arith.addf %47, %49 : vector<2x32xf32>
    %51 = math.tanh %50 : vector<2x32xf32>
    %cst_15 = arith.constant 1.000000e+00 : f32
    %52 = vector.broadcast %cst_15 : f32 to vector<2x32xf32>
    %53 = arith.subf %52, %46 : vector<2x32xf32>
    %54 = arith.mulf %53, %51 : vector<2x32xf32>
    %55 = arith.mulf %46, %32 : vector<2x32xf32>
    %56 = arith.addf %54, %55 : vector<2x32xf32>
    %57 = vector.extract_strided_slice %5 {offsets = [4, 0], sizes = [2, 96], strides = [1, 1]} : vector<16x96xf32> to vector<2x96xf32>
    %cst_16 = arith.constant dense<0.000000e+00> : vector<2x96xf32>
    %58 = tpu.matmul %56, %6, %cst_16 {dimension_numbers = #tpu.dot_dimension_numbers<[1], [0], [0], [1], [0, 0, 1, 1], [], []>} : vector<2x32xf32>, vector<32x96xf32>, vector<2x96xf32> -> vector<2x96xf32>
    %59 = vector.broadcast %7 : vector<1x96xf32> to vector<2x96xf32>
    %60 = arith.addf %58, %59 : vector<2x96xf32>
    %61 = vector.extract_strided_slice %57 {offsets = [0, 0], sizes = [2, 64], strides = [1, 1]} : vector<2x96xf32> to vector<2x64xf32>
    %62 = vector.extract_strided_slice %60 {offsets = [0, 0], sizes = [2, 64], strides = [1, 1]} : vector<2x96xf32> to vector<2x64xf32>
    %63 = arith.addf %61, %62 : vector<2x64xf32>
    %64 = arith.negf %63 : vector<2x64xf32>
    %65 = math.exp %64 : vector<2x64xf32>
    %cst_17 = arith.constant 1.000000e+00 : f32
    %66 = vector.broadcast %cst_17 : f32 to vector<2x64xf32>
    %67 = arith.addf %66, %65 : vector<2x64xf32>
    %68 = arith.divf %66, %67 : vector<2x64xf32>
    %69 = vector.extract_strided_slice %68 {offsets = [0, 0], sizes = [2, 32], strides = [1, 1]} : vector<2x64xf32> to vector<2x32xf32>
    %70 = vector.extract_strided_slice %68 {offsets = [0, 32], sizes = [2, 32], strides = [1, 1]} : vector<2x64xf32> to vector<2x32xf32>
    %71 = vector.extract_strided_slice %57 {offsets = [0, 64], sizes = [2, 32], strides = [1, 1]} : vector<2x96xf32> to vector<2x32xf32>
    %72 = vector.extract_strided_slice %60 {offsets = [0, 64], sizes = [2, 32], strides = [1, 1]} : vector<2x96xf32> to vector<2x32xf32>
    %73 = arith.mulf %69, %72 : vector<2x32xf32>
    %74 = arith.addf %71, %73 : vector<2x32xf32>
    %75 = math.tanh %74 : vector<2x32xf32>
    %cst_18 = arith.constant 1.000000e+00 : f32
    %76 = vector.broadcast %cst_18 : f32 to vector<2x32xf32>
    %77 = arith.subf %76, %70 : vector<2x32xf32>
    %78 = arith.mulf %77, %75 : vector<2x32xf32>
    %79 = arith.mulf %70, %56 : vector<2x32xf32>
    %80 = arith.addf %78, %79 : vector<2x32xf32>
    %81 = vector.extract_strided_slice %5 {offsets = [6, 0], sizes = [2, 96], strides = [1, 1]} : vector<16x96xf32> to vector<2x96xf32>
    %cst_19 = arith.constant dense<0.000000e+00> : vector<2x96xf32>
    %82 = tpu.matmul %80, %6, %cst_19 {dimension_numbers = #tpu.dot_dimension_numbers<[1], [0], [0], [1], [0, 0, 1, 1], [], []>} : vector<2x32xf32>, vector<32x96xf32>, vector<2x96xf32> -> vector<2x96xf32>
    %83 = vector.broadcast %7 : vector<1x96xf32> to vector<2x96xf32>
    %84 = arith.addf %82, %83 : vector<2x96xf32>
    %85 = vector.extract_strided_slice %81 {offsets = [0, 0], sizes = [2, 64], strides = [1, 1]} : vector<2x96xf32> to vector<2x64xf32>
    %86 = vector.extract_strided_slice %84 {offsets = [0, 0], sizes = [2, 64], strides = [1, 1]} : vector<2x96xf32> to vector<2x64xf32>
    %87 = arith.addf %85, %86 : vector<2x64xf32>
    %88 = arith.negf %87 : vector<2x64xf32>
    %89 = math.exp %88 : vector<2x64xf32>
    %cst_20 = arith.constant 1.000000e+00 : f32
    %90 = vector.broadcast %cst_20 : f32 to vector<2x64xf32>
    %91 = arith.addf %90, %89 : vector<2x64xf32>
    %92 = arith.divf %90, %91 : vector<2x64xf32>
    %93 = vector.extract_strided_slice %92 {offsets = [0, 0], sizes = [2, 32], strides = [1, 1]} : vector<2x64xf32> to vector<2x32xf32>
    %94 = vector.extract_strided_slice %92 {offsets = [0, 32], sizes = [2, 32], strides = [1, 1]} : vector<2x64xf32> to vector<2x32xf32>
    %95 = vector.extract_strided_slice %81 {offsets = [0, 64], sizes = [2, 32], strides = [1, 1]} : vector<2x96xf32> to vector<2x32xf32>
    %96 = vector.extract_strided_slice %84 {offsets = [0, 64], sizes = [2, 32], strides = [1, 1]} : vector<2x96xf32> to vector<2x32xf32>
    %97 = arith.mulf %93, %96 : vector<2x32xf32>
    %98 = arith.addf %95, %97 : vector<2x32xf32>
    %99 = math.tanh %98 : vector<2x32xf32>
    %cst_21 = arith.constant 1.000000e+00 : f32
    %100 = vector.broadcast %cst_21 : f32 to vector<2x32xf32>
    %101 = arith.subf %100, %94 : vector<2x32xf32>
    %102 = arith.mulf %101, %99 : vector<2x32xf32>
    %103 = arith.mulf %94, %80 : vector<2x32xf32>
    %104 = arith.addf %102, %103 : vector<2x32xf32>
    %105 = vector.extract_strided_slice %5 {offsets = [8, 0], sizes = [2, 96], strides = [1, 1]} : vector<16x96xf32> to vector<2x96xf32>
    %cst_22 = arith.constant dense<0.000000e+00> : vector<2x96xf32>
    %106 = tpu.matmul %104, %6, %cst_22 {dimension_numbers = #tpu.dot_dimension_numbers<[1], [0], [0], [1], [0, 0, 1, 1], [], []>} : vector<2x32xf32>, vector<32x96xf32>, vector<2x96xf32> -> vector<2x96xf32>
    %107 = vector.broadcast %7 : vector<1x96xf32> to vector<2x96xf32>
    %108 = arith.addf %106, %107 : vector<2x96xf32>
    %109 = vector.extract_strided_slice %105 {offsets = [0, 0], sizes = [2, 64], strides = [1, 1]} : vector<2x96xf32> to vector<2x64xf32>
    %110 = vector.extract_strided_slice %108 {offsets = [0, 0], sizes = [2, 64], strides = [1, 1]} : vector<2x96xf32> to vector<2x64xf32>
    %111 = arith.addf %109, %110 : vector<2x64xf32>
    %112 = arith.negf %111 : vector<2x64xf32>
    %113 = math.exp %112 : vector<2x64xf32>
    %cst_23 = arith.constant 1.000000e+00 : f32
    %114 = vector.broadcast %cst_23 : f32 to vector<2x64xf32>
    %115 = arith.addf %114, %113 : vector<2x64xf32>
    %116 = arith.divf %114, %115 : vector<2x64xf32>
    %117 = vector.extract_strided_slice %116 {offsets = [0, 0], sizes = [2, 32], strides = [1, 1]} : vector<2x64xf32> to vector<2x32xf32>
    %118 = vector.extract_strided_slice %116 {offsets = [0, 32], sizes = [2, 32], strides = [1, 1]} : vector<2x64xf32> to vector<2x32xf32>
    %119 = vector.extract_strided_slice %105 {offsets = [0, 64], sizes = [2, 32], strides = [1, 1]} : vector<2x96xf32> to vector<2x32xf32>
    %120 = vector.extract_strided_slice %108 {offsets = [0, 64], sizes = [2, 32], strides = [1, 1]} : vector<2x96xf32> to vector<2x32xf32>
    %121 = arith.mulf %117, %120 : vector<2x32xf32>
    %122 = arith.addf %119, %121 : vector<2x32xf32>
    %123 = math.tanh %122 : vector<2x32xf32>
    %cst_24 = arith.constant 1.000000e+00 : f32
    %124 = vector.broadcast %cst_24 : f32 to vector<2x32xf32>
    %125 = arith.subf %124, %118 : vector<2x32xf32>
    %126 = arith.mulf %125, %123 : vector<2x32xf32>
    %127 = arith.mulf %118, %104 : vector<2x32xf32>
    %128 = arith.addf %126, %127 : vector<2x32xf32>
    %129 = vector.extract_strided_slice %5 {offsets = [10, 0], sizes = [2, 96], strides = [1, 1]} : vector<16x96xf32> to vector<2x96xf32>
    %cst_25 = arith.constant dense<0.000000e+00> : vector<2x96xf32>
    %130 = tpu.matmul %128, %6, %cst_25 {dimension_numbers = #tpu.dot_dimension_numbers<[1], [0], [0], [1], [0, 0, 1, 1], [], []>} : vector<2x32xf32>, vector<32x96xf32>, vector<2x96xf32> -> vector<2x96xf32>
    %131 = vector.broadcast %7 : vector<1x96xf32> to vector<2x96xf32>
    %132 = arith.addf %130, %131 : vector<2x96xf32>
    %133 = vector.extract_strided_slice %129 {offsets = [0, 0], sizes = [2, 64], strides = [1, 1]} : vector<2x96xf32> to vector<2x64xf32>
    %134 = vector.extract_strided_slice %132 {offsets = [0, 0], sizes = [2, 64], strides = [1, 1]} : vector<2x96xf32> to vector<2x64xf32>
    %135 = arith.addf %133, %134 : vector<2x64xf32>
    %136 = arith.negf %135 : vector<2x64xf32>
    %137 = math.exp %136 : vector<2x64xf32>
    %cst_26 = arith.constant 1.000000e+00 : f32
    %138 = vector.broadcast %cst_26 : f32 to vector<2x64xf32>
    %139 = arith.addf %138, %137 : vector<2x64xf32>
    %140 = arith.divf %138, %139 : vector<2x64xf32>
    %141 = vector.extract_strided_slice %140 {offsets = [0, 0], sizes = [2, 32], strides = [1, 1]} : vector<2x64xf32> to vector<2x32xf32>
    %142 = vector.extract_strided_slice %140 {offsets = [0, 32], sizes = [2, 32], strides = [1, 1]} : vector<2x64xf32> to vector<2x32xf32>
    %143 = vector.extract_strided_slice %129 {offsets = [0, 64], sizes = [2, 32], strides = [1, 1]} : vector<2x96xf32> to vector<2x32xf32>
    %144 = vector.extract_strided_slice %132 {offsets = [0, 64], sizes = [2, 32], strides = [1, 1]} : vector<2x96xf32> to vector<2x32xf32>
    %145 = arith.mulf %141, %144 : vector<2x32xf32>
    %146 = arith.addf %143, %145 : vector<2x32xf32>
    %147 = math.tanh %146 : vector<2x32xf32>
    %cst_27 = arith.constant 1.000000e+00 : f32
    %148 = vector.broadcast %cst_27 : f32 to vector<2x32xf32>
    %149 = arith.subf %148, %142 : vector<2x32xf32>
    %150 = arith.mulf %149, %147 : vector<2x32xf32>
    %151 = arith.mulf %142, %128 : vector<2x32xf32>
    %152 = arith.addf %150, %151 : vector<2x32xf32>
    %153 = vector.extract_strided_slice %5 {offsets = [12, 0], sizes = [2, 96], strides = [1, 1]} : vector<16x96xf32> to vector<2x96xf32>
    %cst_28 = arith.constant dense<0.000000e+00> : vector<2x96xf32>
    %154 = tpu.matmul %152, %6, %cst_28 {dimension_numbers = #tpu.dot_dimension_numbers<[1], [0], [0], [1], [0, 0, 1, 1], [], []>} : vector<2x32xf32>, vector<32x96xf32>, vector<2x96xf32> -> vector<2x96xf32>
    %155 = vector.broadcast %7 : vector<1x96xf32> to vector<2x96xf32>
    %156 = arith.addf %154, %155 : vector<2x96xf32>
    %157 = vector.extract_strided_slice %153 {offsets = [0, 0], sizes = [2, 64], strides = [1, 1]} : vector<2x96xf32> to vector<2x64xf32>
    %158 = vector.extract_strided_slice %156 {offsets = [0, 0], sizes = [2, 64], strides = [1, 1]} : vector<2x96xf32> to vector<2x64xf32>
    %159 = arith.addf %157, %158 : vector<2x64xf32>
    %160 = arith.negf %159 : vector<2x64xf32>
    %161 = math.exp %160 : vector<2x64xf32>
    %cst_29 = arith.constant 1.000000e+00 : f32
    %162 = vector.broadcast %cst_29 : f32 to vector<2x64xf32>
    %163 = arith.addf %162, %161 : vector<2x64xf32>
    %164 = arith.divf %162, %163 : vector<2x64xf32>
    %165 = vector.extract_strided_slice %164 {offsets = [0, 0], sizes = [2, 32], strides = [1, 1]} : vector<2x64xf32> to vector<2x32xf32>
    %166 = vector.extract_strided_slice %164 {offsets = [0, 32], sizes = [2, 32], strides = [1, 1]} : vector<2x64xf32> to vector<2x32xf32>
    %167 = vector.extract_strided_slice %153 {offsets = [0, 64], sizes = [2, 32], strides = [1, 1]} : vector<2x96xf32> to vector<2x32xf32>
    %168 = vector.extract_strided_slice %156 {offsets = [0, 64], sizes = [2, 32], strides = [1, 1]} : vector<2x96xf32> to vector<2x32xf32>
    %169 = arith.mulf %165, %168 : vector<2x32xf32>
    %170 = arith.addf %167, %169 : vector<2x32xf32>
    %171 = math.tanh %170 : vector<2x32xf32>
    %cst_30 = arith.constant 1.000000e+00 : f32
    %172 = vector.broadcast %cst_30 : f32 to vector<2x32xf32>
    %173 = arith.subf %172, %166 : vector<2x32xf32>
    %174 = arith.mulf %173, %171 : vector<2x32xf32>
    %175 = arith.mulf %166, %152 : vector<2x32xf32>
    %176 = arith.addf %174, %175 : vector<2x32xf32>
    %177 = vector.extract_strided_slice %5 {offsets = [14, 0], sizes = [2, 96], strides = [1, 1]} : vector<16x96xf32> to vector<2x96xf32>
    %cst_31 = arith.constant dense<0.000000e+00> : vector<2x96xf32>
    %178 = tpu.matmul %176, %6, %cst_31 {dimension_numbers = #tpu.dot_dimension_numbers<[1], [0], [0], [1], [0, 0, 1, 1], [], []>} : vector<2x32xf32>, vector<32x96xf32>, vector<2x96xf32> -> vector<2x96xf32>
    %179 = vector.broadcast %7 : vector<1x96xf32> to vector<2x96xf32>
    %180 = arith.addf %178, %179 : vector<2x96xf32>
    %181 = vector.extract_strided_slice %177 {offsets = [0, 0], sizes = [2, 64], strides = [1, 1]} : vector<2x96xf32> to vector<2x64xf32>
    %182 = vector.extract_strided_slice %180 {offsets = [0, 0], sizes = [2, 64], strides = [1, 1]} : vector<2x96xf32> to vector<2x64xf32>
    %183 = arith.addf %181, %182 : vector<2x64xf32>
    %184 = arith.negf %183 : vector<2x64xf32>
    %185 = math.exp %184 : vector<2x64xf32>
    %cst_32 = arith.constant 1.000000e+00 : f32
    %186 = vector.broadcast %cst_32 : f32 to vector<2x64xf32>
    %187 = arith.addf %186, %185 : vector<2x64xf32>
    %188 = arith.divf %186, %187 : vector<2x64xf32>
    %189 = vector.extract_strided_slice %188 {offsets = [0, 0], sizes = [2, 32], strides = [1, 1]} : vector<2x64xf32> to vector<2x32xf32>
    %190 = vector.extract_strided_slice %188 {offsets = [0, 32], sizes = [2, 32], strides = [1, 1]} : vector<2x64xf32> to vector<2x32xf32>
    %191 = vector.extract_strided_slice %177 {offsets = [0, 64], sizes = [2, 32], strides = [1, 1]} : vector<2x96xf32> to vector<2x32xf32>
    %192 = vector.extract_strided_slice %180 {offsets = [0, 64], sizes = [2, 32], strides = [1, 1]} : vector<2x96xf32> to vector<2x32xf32>
    %193 = arith.mulf %189, %192 : vector<2x32xf32>
    %194 = arith.addf %191, %193 : vector<2x32xf32>
    %195 = math.tanh %194 : vector<2x32xf32>
    %cst_33 = arith.constant 1.000000e+00 : f32
    %196 = vector.broadcast %cst_33 : f32 to vector<2x32xf32>
    %197 = arith.subf %196, %190 : vector<2x32xf32>
    %198 = arith.mulf %197, %195 : vector<2x32xf32>
    %199 = arith.mulf %190, %176 : vector<2x32xf32>
    %200 = arith.addf %198, %199 : vector<2x32xf32>
    %c0_34 = arith.constant 0 : index
    %c0_35 = arith.constant 0 : index
    %201 = vector.load %arg9[%c0_34, %c0_35] : memref<32x128xf32, #tpu.memory_space<vmem>>, vector<32x128xf32>
    %cst_36 = arith.constant dense<0.000000e+00> : vector<2x128xf32>
    %202 = tpu.matmul %200, %201, %cst_36 {dimension_numbers = #tpu.dot_dimension_numbers<[1], [0], [0], [1], [0, 0, 1, 1], [], []>} : vector<2x32xf32>, vector<32x128xf32>, vector<2x128xf32> -> vector<2x128xf32>
    %203 = vector.extract_strided_slice %202 {offsets = [0, 0], sizes = [2, 64], strides = [1, 1]} : vector<2x128xf32> to vector<2x64xf32>
    %204 = vector.extract_strided_slice %202 {offsets = [0, 64], sizes = [2, 64], strides = [1, 1]} : vector<2x128xf32> to vector<2x64xf32>
    %c0_37 = arith.constant 0 : index
    %c0_38 = arith.constant 0 : index
    %205 = vector.load %arg10[%c0_37, %c0_38] : memref<1x64xf32, #tpu.memory_space<vmem>>, vector<1x64xf32>
    %206 = vector.broadcast %205 : vector<1x64xf32> to vector<2x64xf32>
    %207 = arith.addf %204, %206 : vector<2x64xf32>
    %208 = vector.extract_strided_slice %207 {offsets = [0, 0], sizes = [2, 32], strides = [1, 1]} : vector<2x64xf32> to vector<2x32xf32>
    %209 = math.tanh %208 : vector<2x32xf32>
    %210 = vector.extract_strided_slice %207 {offsets = [0, 32], sizes = [2, 32], strides = [1, 1]} : vector<2x64xf32> to vector<2x32xf32>
    %211 = arith.negf %210 : vector<2x32xf32>
    %212 = math.exp %211 : vector<2x32xf32>
    %cst_39 = arith.constant 1.000000e+00 : f32
    %213 = vector.broadcast %cst_39 : f32 to vector<2x32xf32>
    %214 = arith.addf %213, %212 : vector<2x32xf32>
    %215 = arith.divf %213, %214 : vector<2x32xf32>
    %216 = arith.mulf %209, %215 : vector<2x32xf32>
    %c0_40 = arith.constant 0 : index
    %c0_41 = arith.constant 0 : index
    %217 = vector.load %arg1[%c0_40, %c0_41] : memref<16x16xf32, #tpu.memory_space<vmem>>, vector<16x16xf32>
    %218 = vector.extract_strided_slice %203 {offsets = [0, 0], sizes = [1, 64], strides = [1, 1]} : vector<2x64xf32> to vector<1x64xf32>
    %219 = vector.shape_cast %218 : vector<1x64xf32> to vector<1x64xf32>
    %220 = vector.broadcast %219 : vector<1x64xf32> to vector<8x64xf32>
    %221 = vector.extract_strided_slice %203 {offsets = [1, 0], sizes = [1, 64], strides = [1, 1]} : vector<2x64xf32> to vector<1x64xf32>
    %222 = vector.shape_cast %221 : vector<1x64xf32> to vector<1x64xf32>
    %223 = vector.broadcast %222 : vector<1x64xf32> to vector<8x64xf32>
    %224 = tpu.concatenate %220, %223 in 0 : vector<8x64xf32>, vector<8x64xf32> -> vector<16x64xf32>
    %c0_42 = arith.constant 0 : index
    %c0_43 = arith.constant 0 : index
    %225 = vector.load %arg7[%c0_42, %c0_43] : memref<16x64xf32, #tpu.memory_space<vmem>>, vector<16x64xf32>
    %cst_44 = arith.constant dense<0.000000e+00> : vector<16x64xf32>
    %226 = tpu.matmul %217, %225, %cst_44 {dimension_numbers = #tpu.dot_dimension_numbers<[1], [0], [0], [1], [0, 0, 1, 1], [], []>} : vector<16x16xf32>, vector<16x64xf32>, vector<16x64xf32> -> vector<16x64xf32>
    %227 = arith.addf %226, %224 : vector<16x64xf32>
    %c0_45 = arith.constant 0 : index
    %c0_46 = arith.constant 0 : index
    %228 = vector.load %arg8[%c0_45, %c0_46] : memref<1x64xf32, #tpu.memory_space<vmem>>, vector<1x64xf32>
    %229 = vector.broadcast %228 : vector<1x64xf32> to vector<16x64xf32>
    %230 = arith.addf %227, %229 : vector<16x64xf32>
    %231 = vector.extract_strided_slice %230 {offsets = [0, 0], sizes = [16, 32], strides = [1, 1]} : vector<16x64xf32> to vector<16x32xf32>
    %232 = math.tanh %231 : vector<16x32xf32>
    %233 = vector.extract_strided_slice %230 {offsets = [0, 32], sizes = [16, 32], strides = [1, 1]} : vector<16x64xf32> to vector<16x32xf32>
    %234 = arith.negf %233 : vector<16x32xf32>
    %235 = math.exp %234 : vector<16x32xf32>
    %cst_47 = arith.constant 1.000000e+00 : f32
    %236 = vector.broadcast %cst_47 : f32 to vector<16x32xf32>
    %237 = arith.addf %236, %235 : vector<16x32xf32>
    %238 = arith.divf %236, %237 : vector<16x32xf32>
    %239 = arith.mulf %232, %238 : vector<16x32xf32>
    %c0_48 = arith.constant 0 : index
    %c0_49 = arith.constant 0 : index
    %240 = vector.load %arg11[%c0_48, %c0_49] : memref<1x32xf32, #tpu.memory_space<vmem>>, vector<1x32xf32>
    %241 = vector.broadcast %240 : vector<1x32xf32> to vector<16x32xf32>
    %242 = arith.mulf %239, %241 : vector<16x32xf32>
    %cst_50 = arith.constant dense<0.000000e+00> : vector<16xf32>
    %243 = vector.multi_reduction <add>, %242, %cst_50 [1] : vector<16x32xf32> to vector<16xf32>
    %244 = vector.shape_cast %243 : vector<16xf32> to vector<16x1xf32>
    %c0_51 = arith.constant 0 : index
    %c0_52 = arith.constant 0 : index
    %245 = vector.load %arg12[%c0_51, %c0_52] : memref<1x1xf32, #tpu.memory_space<vmem>>, vector<1x1xf32>
    %246 = vector.broadcast %245 : vector<1x1xf32> to vector<16x1xf32>
    %247 = arith.addf %244, %246 : vector<16x1xf32>
    %cst_53 = arith.constant dense<0xFF800000> : vector<1xf32>
    %248 = vector.multi_reduction <maximumf>, %247, %cst_53 [0] : vector<16x1xf32> to vector<1xf32>
    %249 = vector.shape_cast %248 : vector<1xf32> to vector<1x1xf32>
    %250 = vector.broadcast %249 : vector<1x1xf32> to vector<16x1xf32>
    %251 = arith.subf %247, %250 : vector<16x1xf32>
    %252 = math.exp %251 : vector<16x1xf32>
    %c0_54 = arith.constant 0 : index
    %c0_55 = arith.constant 0 : index
    %253 = vector.load %arg2[%c0_54, %c0_55] : memref<2x16xf32, #tpu.memory_space<vmem>>, vector<2x16xf32>
    %254 = vector.broadcast %252 : vector<16x1xf32> to vector<16x16xf32>
    %255 = arith.mulf %217, %254 : vector<16x16xf32>
    %256 = tpu.concatenate %255, %252 in 1 : vector<16x16xf32>, vector<16x1xf32> -> vector<16x17xf32>
    %cst_56 = arith.constant dense<0.000000e+00> : vector<2x17xf32>
    %257 = tpu.matmul %253, %256, %cst_56 {dimension_numbers = #tpu.dot_dimension_numbers<[1], [0], [0], [1], [0, 0, 1, 1], [], []>} : vector<2x16xf32>, vector<16x17xf32>, vector<2x17xf32> -> vector<2x17xf32>
    %258 = vector.extract_strided_slice %257 {offsets = [0, 0], sizes = [2, 16], strides = [1, 1]} : vector<2x17xf32> to vector<2x16xf32>
    %259 = vector.extract_strided_slice %257 {offsets = [0, 16], sizes = [2, 1], strides = [1, 1]} : vector<2x17xf32> to vector<2x1xf32>
    %260 = tpu.reciprocal %259 : vector<2x1xf32> -> vector<2x1xf32>
    %261 = vector.broadcast %260 : vector<2x1xf32> to vector<2x16xf32>
    %262 = arith.mulf %258, %261 : vector<2x16xf32>
    %c0_57 = arith.constant 0 : index
    %c0_58 = arith.constant 0 : index
    %263 = vector.load %arg13[%c0_57, %c0_58] : memref<16x64xf32, #tpu.memory_space<vmem>>, vector<16x64xf32>
    %cst_59 = arith.constant dense<0.000000e+00> : vector<2x64xf32>
    %264 = tpu.matmul %262, %263, %cst_59 {dimension_numbers = #tpu.dot_dimension_numbers<[1], [0], [0], [1], [0, 0, 1, 1], [], []>} : vector<2x16xf32>, vector<16x64xf32>, vector<2x64xf32> -> vector<2x64xf32>
    %c0_60 = arith.constant 0 : index
    %c0_61 = arith.constant 0 : index
    %265 = vector.load %arg14[%c0_60, %c0_61] : memref<1x64xf32, #tpu.memory_space<vmem>>, vector<1x64xf32>
    %266 = vector.broadcast %265 : vector<1x64xf32> to vector<2x64xf32>
    %267 = arith.addf %264, %266 : vector<2x64xf32>
    %268 = vector.extract_strided_slice %267 {offsets = [0, 0], sizes = [2, 32], strides = [1, 1]} : vector<2x64xf32> to vector<2x32xf32>
    %269 = math.tanh %268 : vector<2x32xf32>
    %270 = vector.extract_strided_slice %267 {offsets = [0, 32], sizes = [2, 32], strides = [1, 1]} : vector<2x64xf32> to vector<2x32xf32>
    %271 = arith.negf %270 : vector<2x32xf32>
    %272 = math.exp %271 : vector<2x32xf32>
    %cst_62 = arith.constant 1.000000e+00 : f32
    %273 = vector.broadcast %cst_62 : f32 to vector<2x32xf32>
    %274 = arith.addf %273, %272 : vector<2x32xf32>
    %275 = arith.divf %273, %274 : vector<2x32xf32>
    %276 = arith.mulf %269, %275 : vector<2x32xf32>
    %277 = arith.mulf %216, %276 : vector<2x32xf32>
    %c0_63 = arith.constant 0 : index
    %c0_64 = arith.constant 0 : index
    %278 = vector.load %arg15[%c0_63, %c0_64] : memref<32x64xf32, #tpu.memory_space<vmem>>, vector<32x64xf32>
    %cst_65 = arith.constant dense<0.000000e+00> : vector<2x64xf32>
    %279 = tpu.matmul %277, %278, %cst_65 {dimension_numbers = #tpu.dot_dimension_numbers<[1], [0], [0], [1], [0, 0, 1, 1], [], []>} : vector<2x32xf32>, vector<32x64xf32>, vector<2x64xf32> -> vector<2x64xf32>
    %c0_66 = arith.constant 0 : index
    %c0_67 = arith.constant 0 : index
    %280 = vector.load %arg16[%c0_66, %c0_67] : memref<1x64xf32, #tpu.memory_space<vmem>>, vector<1x64xf32>
    %281 = vector.broadcast %280 : vector<1x64xf32> to vector<2x64xf32>
    %282 = arith.addf %279, %281 : vector<2x64xf32>
    %283 = vector.extract_strided_slice %282 {offsets = [0, 0], sizes = [2, 32], strides = [1, 1]} : vector<2x64xf32> to vector<2x32xf32>
    %284 = math.tanh %283 : vector<2x32xf32>
    %285 = vector.extract_strided_slice %282 {offsets = [0, 32], sizes = [2, 32], strides = [1, 1]} : vector<2x64xf32> to vector<2x32xf32>
    %286 = arith.negf %285 : vector<2x32xf32>
    %287 = math.exp %286 : vector<2x32xf32>
    %cst_68 = arith.constant 1.000000e+00 : f32
    %288 = vector.broadcast %cst_68 : f32 to vector<2x32xf32>
    %289 = arith.addf %288, %287 : vector<2x32xf32>
    %290 = arith.divf %288, %289 : vector<2x32xf32>
    %291 = arith.mulf %284, %290 : vector<2x32xf32>
    %c0_69 = arith.constant 0 : index
    %c0_70 = arith.constant 0 : index
    %292 = vector.load %arg17[%c0_69, %c0_70] : memref<32x128xf32, #tpu.memory_space<vmem>>, vector<32x128xf32>
    %cst_71 = arith.constant dense<0.000000e+00> : vector<2x128xf32>
    %293 = tpu.matmul %291, %292, %cst_71 {dimension_numbers = #tpu.dot_dimension_numbers<[1], [0], [0], [1], [0, 0, 1, 1], [], []>} : vector<2x32xf32>, vector<32x128xf32>, vector<2x128xf32> -> vector<2x128xf32>
    %c0_72 = arith.constant 0 : index
    %c0_73 = arith.constant 0 : index
    %294 = vector.load %arg18[%c0_72, %c0_73] : memref<1x128xf32, #tpu.memory_space<vmem>>, vector<1x128xf32>
    %295 = vector.broadcast %294 : vector<1x128xf32> to vector<2x128xf32>
    %296 = arith.addf %293, %295 : vector<2x128xf32>
    %c0_74 = arith.constant 0 : index
    %c0_75 = arith.constant 0 : index
    %297 = vector.load %arg19[%c0_74, %c0_75] : memref<2x128xf32, #tpu.memory_space<vmem>>, vector<2x128xf32>
    tpu.vector_store %arg19[%c0_74, %c0_75], %296 {strides = array<i32>} : memref<2x128xf32, #tpu.memory_space<vmem>>, vector<2x128xf32>,
    return
  }
}

</mosaic_0001>

<bundles_post_ra>
// kernel: updown_forward.1
= control target key start
LH: loop header
LB: loop body
LE: loop exit
PB: predicated region body
PF: predicated region fallthrough
CT: control target
= control target key end

     0   :  { %s2536_s0 = inlined_call_operand.vmem [shape: f32[16,16], index: 0, kind: input, shape index: {}]   ;;  %s2537_s1 = inlined_call_operand.vmem [shape: f32[16,16], index: 1, kind: input, shape index: {}]   ;;  %s2538_s2 = inlined_call_operand.vmem [shape: f32[2,16], index: 2, kind: input, shape index: {}]   ;;  %s2539_s3 = inlined_call_operand.vmem [shape: f32[16,96], index: 3, kind: input, shape index: {}]   ;;  %s2540_s4 = inlined_call_operand.vmem [shape: f32[1,96], index: 4, kind: input, shape index: {}]   ;;  %s2541_s5 = inlined_call_operand.vmem [shape: f32[32,96], index: 5, kind: input, shape index: {}]   ;;  %s2542_s6 = inlined_call_operand.vmem [shape: f32[1,96], index: 6, kind: input, shape index: {}]   ;;  %s2543_s7 = inlined_call_operand.vmem [shape: f32[16,64], index: 7, kind: input, shape index: {}]   ;;  %s2544_s8 = inlined_call_operand.vmem [shape: f32[1,64], index: 8, kind: input, shape index: {}]   ;;  %s2545_s9 = inlined_call_operand.vmem [shape: f32[32,128], index: 9, kind: input, shape index: {}]   ;;  %s2546_s10 = inlined_call_operand.vmem [shape: f32[1,64], index: 10, kind: input, shape index: {}]   ;;  %s2547_s11 = inlined_call_operand.vmem [shape: f32[1,32], index: 11, kind: input, shape index: {}]   ;;  %s2548_s12 = inlined_call_operand.<no memory space> [shape: f32[1,1], index: 12, kind: input, shape index: {}]   ;;  %s2549_s13 = inlined_call_operand.vmem [shape: f32[16,64], index: 13, kind: input, shape index: {}]   ;;  %s2550_s14 = inlined_call_operand.vmem [shape: f32[1,64], index: 14, kind: input, shape index: {}]   ;;  %s2551_s15 = inlined_call_operand.vmem [shape: f32[32,64], index: 15, kind: input, shape index: {}]   ;;  %s2552_s16 = inlined_call_operand.vmem [shape: f32[1,64], index: 16, kind: input, shape index: {}]   ;;  %s2553_s17 = inlined_call_operand.vmem [shape: f32[32,128], index: 17, kind: input, shape index: {}]   ;;  %s2554_s18 = inlined_call_operand.vmem [shape: f32[1,128], index: 18, kind: input, shape index: {}]   ;;  %s2555_s19 = inlined_call_operand.hbm [shape: f32[2,128], index: 19, kind: output, shape index: {}]  }
   0x1   :  { %2559 = sst [smem:[#allocation6_spill]] %s2536_s0  ;;  %v24_v0 = vstv %s2548_s12 }
   0x2   :  { %2560 = sst [smem:[#allocation7_spill]] %s2537_s1  ;;  %25 = vst [vmem:[#allocation2] sm:$0x1] %v24_v0 }
   0x3   :  { %2561 = sst [smem:[#allocation8_spill]] %s2538_s2 }
   0x4   :  { %2562 = sst [smem:[#allocation9_spill]] %s2539_s3 }
   0x5   :  { %v158_v1 = vld [vmem:[%s2541_s5] sm:$0xff]  ;;  %v159_v2 = vld [vmem:[%s2541_s5 + $0x8] sm:$0xff]  ;;  %s2563_s24 = sld [smem:[#allocation9_spill]]  ;;  %vm76_vm0 = vcmask 130048   ;;  %v2133_v4 = vmov 0.0|0.0   ;;  %v160_v7 = vld [vmem:[%s2541_s5 + $0x10] sm:$0xff] }
   0x6   :  { %1931 = vmatprep.subr.bf16.mxu1 %v2133_v4  ;;  %v2255_v5 = vpack.c.bf16 %v159_v2, %v158_v1  ;;  %v161_v8 = vld [vmem:[%s2541_s5 + $0x18] sm:$0xff]  ;;  %s2564_s30 = sld [smem:[#allocation6_spill]]  ;;  %vm2134_vm1 = vmmov 0   ;;  %v2135_v11 = vmov 0.0  }
   0x7   :  { %1793 = vmatprep.mubr.msk.f32.mxu1 %vm2134_vm1, %v2135_v11 }
   0xb   :  { %v67_v3 = vld [vmem:[%s2563_s24] sm:$0xff]  ;;  %v68_v6 = vld [vmem:[%s2563_s24 + $0x8] sm:$0xff] }
   0xc   :  { %v1927_v9 = vpack.c.bf16 %v68_v6, %v67_v3  ;;  %v65_v10 = vld [vmem:[%s2564_s30] sm:$0xff] }
   0xd   :  { %26 = vsyncpa [#allocation4], 0  ;;  %1933 = vmatpush3.bf16.msra.mxu1 %v2255_v5  ;;  %v2272_v12 = vpack.c.bf16 %v161_v8, %v160_v7  ;;  %1782 = vmatprep.mubr.msk.f32.mxu0 %vm76_vm0, %v65_v10  ;;  %v66_v13 = vld [vmem:[%s2564_s30 + $0x8] sm:$0xff]  ;;  %v1671_v15 = vld [vmem:[%s2540_s4] ss:$0 sm:$0xff]  ;;  %s2136_s23 = smov 64  }
   0xe   :  { %1928 = vmatprep.subr.bf16.mxu0 %v1927_v9  ;;  %1934 = vmatprep.subr.bf16.mxu1 %v2133_v4  ;;  %v2302_v16 = vld [vmem:[%s2542_s6] ss:$0 sm:$0xff]  ;;  %s2137_s4 = smov 96   ;;  %vm169_vm2 = vcmask 261120   ;;  %s2565_s1 = sld [smem:[#allocation7_spill]]  ;;  %vm1258_vm3 = vcmask 7168  }
   0xf   :  { %1930 = vmatpush3.bf16.msra.mxu0 %v1927_v9  ;;  %s2566_s25 = sld [smem:[#allocation8_spill]] }
  0x10   :  { %1937 = vmatprep.subr.bf16.mxu0 %v2133_v4 }
  0x11   :  { %1936 = vmatpush3.bf16.msra.mxu1 %v2272_v12 }
  0x12   :  { %1783 = vmatmul.mubr.msk.f32.vlgmr.msra.gmra.mrb[0].mxu0 %vm76_vm0, %v66_v13  ;;  %1943 = vmatprep.subr.bf16.mxu1 %v2133_v4 }
  0x13   :  { %1939 = vmatpush3.bf16.msra.mxu0 %v2255_v5  ;;  %1804 = vmatprep.mubr.msk.f32.mxu0 %vm2134_vm1, %v2135_v11 }
  0x14   :  { %1794 = vmatmul.mubr.f32.vlgmr.msra.gmra.mrb[0].mxu1 %v2135_v11  ;;  %1940 = vmatprep.subr.bf16.mxu0 %v2133_v4 }
  0x15   :  { %1945 = vmatpush3.bf16.msra.mxu1 %v2255_v5  ;;  %1815 = vmatprep.mubr.msk.f32.mxu1 %vm2134_vm1, %v2135_v11 }
  0x16   :  { %1946 = vmatprep.subr.bf16.mxu1 %v2133_v4 }
  0x17   :  { %1942 = vmatpush3.bf16.msra.mxu0 %v2272_v12 }
  0x18   :  { %1949 = vmatprep.subr.bf16.mxu0 %v2133_v4 }
  0x19   :  { %1948 = vmatpush3.bf16.msra.mxu1 %v2272_v12 }
  0x1a   :  { %1955 = vmatprep.subr.bf16.mxu1 %v2133_v4 }
  0xe5   :  { %v1784_v14 = vpop.f32.mrb[0].mxu0 }
  0xe6   :  { %v2304_v17 = vadd.f32 %v1784_v14, %v1671_v15  ;;  %v149_v18 = vpop.f32.mrb[1].mxu0 }
  0xe7   :  { %v239_v19 = vpop.f32.mrb[0].mxu1  ;;  %v2308_v22 = vadd.f32 %v1671_v15, %v149_v18 }
  0xe8   :  { %v240_v20 = vadd.f32 %v2302_v16, %v239_v19  ;;  %v1795_v21 = vpop.f32.mrb[1].mxu1 }
  0xea   :  { %251 = vrot.lane.b32.xlu0 %v240_v20, %s2136_s23  ;;  %v243_v23 = vadd.f32 %v240_v20, %v2308_v22 }
  0xec   :  { %v1675_v24 = vmul.f32 -1.442695, %v243_v23 }
  0xee   :  { %2025 = vpow2.f32 %v1675_v24 }
  0xf8   :  { %v2026_v25 = vpop.eup %2025 }
  0xf9   :  { %v247_v26 = vadd.f32 1.0, %v2026_v25 }
  0xfb   :  { %2027 = vrcp.f32 %v247_v26 }
 0x105   :  { %v2028_v27 = vpop.eup %2027 }
 0x106   :  { %v261_v33 = vsub.f32 1.0, %v2028_v27  ;;  %v267_v35 = vmul.f32 0.0, %v2028_v27 }
 0x15c   :  { %v252_v28 = vpop.permute.xlu0 %251 }
 0x15d   :  { %v254_v29 = vmul.f32 %v2028_v27, %v252_v28 }
 0x15f   :  { %256 = vrot.lane.b32.xlu0 %v254_v29, %s2136_s23 }
 0x1d1   :  { %v257_v30 = vpop.permute.xlu0 %256 }
 0x1d2   :  { %v259_v31 = vadd.f32 %v257_v30, %v2308_v22 }
 0x1d4   :  { %2029 = vtanh.f32 %v259_v31 }
 0x1de   :  { %v2030_v32 = vpop.eup %2029 }
 0x1df   :  { %263 = vrot.lane.b32.xlu1 %v2030_v32, %s2137_s4 }
 0x251   :  { %v264_v34 = vpop.permute.xlu1 %263 }
 0x252   :  { %v266_v36 = vmul.f32 %v264_v34, %v261_v33 }
 0x254   :  { %v268_v37 = vadd.f32 %v267_v35, %v266_v36 }
 0x256   :  { %270 = vrot.lane.b32.xlu1 %v268_v37, %s2137_s4  ;;  %v370_v53 = vrot.slane %v268_v37, 6 }
 0x2c8   :  { %v271_v38 = vpop.permute.xlu1 %270 }
 0x2c9   :  { %1805 = vmatmul.mubr.msk.f32.vlgmr.msra.gmra.mrb[2].mxu0 %vm169_vm2, %v271_v38 }
 0x2ca   :  { %1951 = vmatpush3.bf16.msra.mxu0 %v2255_v5  ;;  %1826 = vmatprep.mubr.msk.f32.mxu0 %vm2134_vm1, %v2135_v11 }
 0x2cb   :  { %1952 = vmatprep.subr.bf16.mxu0 %v2133_v4 }
 0x2ce   :  { %1954 = vmatpush3.bf16.msra.mxu0 %v2272_v12 }
 0x2cf   :  { %1961 = vmatprep.subr.bf16.mxu0 %v2133_v4 }
 0x39c   :  { %v340_v39 = vpop.f32.mrb[2].mxu0 }
 0x39d   :  { %v341_v40 = vadd.f32 %v2302_v16, %v340_v39  ;;  %v1806_v41 = vpop.f32.mrb[3].mxu0 }
 0x39f   :  { %v345_v42 = vrot.slane %v341_v40, 6 }
 0x3a1   :  { %354 = vrot.lane.b32.xlu0 %v345_v42, %s2136_s23  ;;  %v347_v43 = vadd.f32 %v345_v42, %v2308_v22 }
 0x3a3   :  { %v1677_v44 = vmul.f32 -1.442695, %v347_v43 }
 0x3a5   :  { %2031 = vpow2.f32 %v1677_v44 }
 0x3af   :  { %v2032_v45 = vpop.eup %2031 }
 0x3b0   :  { %v351_v46 = vadd.f32 1.0, %v2032_v45 }
 0x3b2   :  { %2033 = vrcp.f32 %v351_v46 }
 0x3bc   :  { %v2034_v47 = vpop.eup %2033 }
 0x3bd   :  { %v364_v54 = vsub.f32 1.0, %v2034_v47  ;;  %v372_v57 = vmul.f32 %v2034_v47, %v370_v53 }
 0x413   :  { %v355_v48 = vpop.permute.xlu0 %354 }
 0x414   :  { %v357_v49 = vmul.f32 %v2034_v47, %v355_v48 }
 0x416   :  { %359 = vrot.lane.b32.xlu1 %v357_v49, %s2136_s23 }
 0x488   :  { %v360_v50 = vpop.permute.xlu1 %359 }
 0x489   :  { %v362_v51 = vadd.f32 %v360_v50, %v2308_v22 }
 0x48b   :  { %2035 = vtanh.f32 %v362_v51 }
 0x495   :  { %v2036_v52 = vpop.eup %2035 }
 0x496   :  { %366 = vrot.lane.b32.xlu0 %v2036_v52, %s2137_s4 }
 0x508   :  { %v367_v55 = vpop.permute.xlu0 %366 }
 0x509   :  { %v369_v56 = vmul.f32 %v367_v55, %v364_v54 }
 0x50b   :  { %v373_v58 = vadd.f32 %v372_v57, %v369_v56 }
 0x50d   :  { %v375_v59 = vrot.slane %v373_v58, 2  ;;  %v476_v15 = vrot.slane %v373_v58, 6 }
 0x50f   :  { %376 = vrot.lane.b32.xlu1 %v375_v59, %s2137_s4 }
 0x581   :  { %v377_v60 = vpop.permute.xlu1 %376 }
 0x582   :  { %1816 = vmatmul.mubr.msk.f32.vlgmr.msra.gmra.mrb[2].mxu1 %vm169_vm2, %v377_v60 }
 0x583   :  { %1957 = vmatpush3.bf16.msra.mxu1 %v2255_v5  ;;  %1837 = vmatprep.mubr.msk.f32.mxu1 %vm2134_vm1, %v2135_v11 }
 0x584   :  { %1958 = vmatprep.subr.bf16.mxu1 %v2133_v4 }
 0x587   :  { %1960 = vmatpush3.bf16.msra.mxu1 %v2272_v12 }
 0x588   :  { %1967 = vmatprep.subr.bf16.mxu1 %v2133_v4 }
 0x655   :  { %v446_v61 = vpop.f32.mrb[2].mxu1 }
 0x656   :  { %v447_v62 = vadd.f32 %v2302_v16, %v446_v61  ;;  %v1817_v63 = vpop.f32.mrb[3].mxu1 }
 0x658   :  { %v451_v0 = vrot.slane %v447_v62, 4 }
 0x65a   :  { %460 = vrot.lane.b32.xlu0 %v451_v0, %s2136_s23  ;;  %v453_v1 = vadd.f32 %v451_v0, %v2308_v22 }
 0x65c   :  { %v1679_v2 = vmul.f32 -1.442695, %v453_v1 }
 0x65e   :  { %2037 = vpow2.f32 %v1679_v2 }
 0x668   :  { %v2038_v3 = vpop.eup %2037 }
 0x669   :  { %v457_v6 = vadd.f32 1.0, %v2038_v3 }
 0x66b   :  { %2039 = vrcp.f32 %v457_v6 }
 0x675   :  { %v2040_v7 = vpop.eup %2039 }
 0x676   :  { %v470_v18 = vsub.f32 1.0, %v2040_v7  ;;  %v478_v20 = vmul.f32 %v2040_v7, %v476_v15 }
 0x6cc   :  { %v461_v8 = vpop.permute.xlu0 %460 }
 0x6cd   :  { %v463_v9 = vmul.f32 %v2040_v7, %v461_v8 }
 0x6cf   :  { %465 = vrot.lane.b32.xlu1 %v463_v9, %s2136_s23 }
 0x741   :  { %v466_v10 = vpop.permute.xlu1 %465 }
 0x742   :  { %v468_v13 = vadd.f32 %v466_v10, %v2308_v22 }
 0x744   :  { %2041 = vtanh.f32 %v468_v13 }
 0x74e   :  { %v2042_v14 = vpop.eup %2041 }
 0x74f   :  { %472 = vrot.lane.b32.xlu0 %v2042_v14, %s2137_s4 }
 0x7c1   :  { %v473_v19 = vpop.permute.xlu0 %472 }
 0x7c2   :  { %v475_v21 = vmul.f32 %v473_v19, %v470_v18 }
 0x7c4   :  { %v479_v23 = vadd.f32 %v478_v20, %v475_v21 }
 0x7c6   :  { %v481_v24 = vrot.slane %v479_v23, 4  ;;  %v582_v40 = vrot.slane %v479_v23, 6 }
 0x7c8   :  { %482 = vrot.lane.b32.xlu1 %v481_v24, %s2137_s4 }
 0x83a   :  { %v483_v25 = vpop.permute.xlu1 %482 }
 0x83b   :  { %1827 = vmatmul.mubr.msk.f32.vlgmr.msra.gmra.mrb[4].mxu0 %vm169_vm2, %v483_v25 }
 0x83c   :  { %1963 = vmatpush3.bf16.msra.mxu0 %v2255_v5  ;;  %1848 = vmatprep.mubr.msk.f32.mxu0 %vm2134_vm1, %v2135_v11 }
 0x83d   :  { %1964 = vmatprep.subr.bf16.mxu0 %v2133_v4 }
 0x840   :  { %1966 = vmatpush3.bf16.msra.mxu0 %v2272_v12 }
 0x841   :  { %1973 = vmatprep.subr.bf16.mxu0 %v2133_v4 }
 0x90e   :  { %v552_v26 = vpop.f32.mrb[4].mxu0 }
 0x90f   :  { %v553_v27 = vadd.f32 %v2302_v16, %v552_v26  ;;  %v1828_v28 = vpop.f32.mrb[5].mxu0 }
 0x911   :  { %v557_v29 = vrot.slane %v553_v27, 2 }
 0x913   :  { %566 = vrot.lane.b32.xlu0 %v557_v29, %s2136_s23  ;;  %v559_v30 = vadd.f32 %v557_v29, %v2308_v22 }
 0x915   :  { %v1681_v31 = vmul.f32 -1.442695, %v559_v30 }
 0x917   :  { %2043 = vpow2.f32 %v1681_v31 }
 0x921   :  { %v2044_v32 = vpop.eup %2043 }
 0x922   :  { %v563_v33 = vadd.f32 1.0, %v2044_v32 }
 0x924   :  { %2045 = vrcp.f32 %v563_v33 }
 0x92e   :  { %v2046_v34 = vpop.eup %2045 }
 0x92f   :  { %v576_v41 = vsub.f32 1.0, %v2046_v34  ;;  %v584_v43 = vmul.f32 %v2046_v34, %v582_v40 }
 0x985   :  { %v567_v35 = vpop.permute.xlu0 %566 }
 0x986   :  { %v569_v36 = vmul.f32 %v2046_v34, %v567_v35 }
 0x988   :  { %571 = vrot.lane.b32.xlu1 %v569_v36, %s2136_s23 }
 0x9fa   :  { %v572_v37 = vpop.permute.xlu1 %571 }
 0x9fb   :  { %v574_v38 = vadd.f32 %v572_v37, %v2308_v22 }
 0x9fd   :  { %2047 = vtanh.f32 %v574_v38 }
 0xa07   :  { %v2048_v39 = vpop.eup %2047 }
 0xa08   :  { %578 = vrot.lane.b32.xlu0 %v2048_v39, %s2137_s4 }
 0xa7a   :  { %v579_v42 = vpop.permute.xlu0 %578 }
 0xa7b   :  { %v581_v44 = vmul.f32 %v579_v42, %v576_v41 }
 0xa7d   :  { %v585_v45 = vadd.f32 %v584_v43, %v581_v44 }
 0xa7f   :  { %v587_v46 = vrot.slane %v585_v45, 6 }
 0xa81   :  { %588 = vrot.lane.b32.xlu1 %v587_v46, %s2137_s4 }
 0xaf3   :  { %v589_v47 = vpop.permute.xlu1 %588 }
 0xaf4   :  { %1838 = vmatmul.mubr.msk.f32.vlgmr.msra.gmra.mrb[4].mxu1 %vm169_vm2, %v589_v47 }
 0xaf5   :  { %1969 = vmatpush3.bf16.msra.mxu1 %v2255_v5  ;;  %1859 = vmatprep.mubr.msk.f32.mxu1 %vm2134_vm1, %v2135_v11 }
 0xaf6   :  { %1970 = vmatprep.subr.bf16.mxu1 %v2133_v4 }
 0xaf9   :  { %1972 = vmatpush3.bf16.msra.mxu1 %v2272_v12 }
 0xafa   :  { %1979 = vmatprep.subr.bf16.mxu1 %v2133_v4 }
 0xbc7   :  { %v658_v22 = vpop.f32.mrb[4].mxu1 }
 0xbc8   :  { %v659_v48 = vadd.f32 %v2302_v16, %v658_v22  ;;  %v1839_v49 = vpop.f32.mrb[5].mxu1 }
 0xbca   :  { %670 = vrot.lane.b32.xlu0 %v659_v48, %s2136_s23  ;;  %v662_v50 = vadd.f32 %v659_v48, %v2304_v17 }
 0xbcc   :  { %v1683_v51 = vmul.f32 -1.442695, %v662_v50 }
 0xbce   :  { %2049 = vpow2.f32 %v1683_v51 }
 0xbd8   :  { %v2050_v52 = vpop.eup %2049 }
 0xbd9   :  { %v666_v53 = vadd.f32 1.0, %v2050_v52 }
 0xbdb   :  { %2051 = vrcp.f32 %v666_v53 }
 0xbe5   :  { %v2052_v54 = vpop.eup %2051 }
 0xbe6   :  { %v680_v60 = vsub.f32 1.0, %v2052_v54  ;;  %v687_v62 = vmul.f32 %v2052_v54, %v587_v46 }
 0xc3c   :  { %v671_v55 = vpop.permute.xlu0 %670 }
 0xc3d   :  { %v673_v56 = vmul.f32 %v2052_v54, %v671_v55 }
 0xc3f   :  { %675 = vrot.lane.b32.xlu1 %v673_v56, %s2136_s23 }
 0xcb1   :  { %v676_v57 = vpop.permute.xlu1 %675 }
 0xcb2   :  { %v678_v58 = vadd.f32 %v676_v57, %v2304_v17 }
 0xcb4   :  { %2053 = vtanh.f32 %v678_v58 }
 0xcbe   :  { %v2054_v59 = vpop.eup %2053 }
 0xcbf   :  { %682 = vrot.lane.b32.xlu0 %v2054_v59, %s2137_s4 }
 0xd31   :  { %v683_v61 = vpop.permute.xlu0 %682 }
 0xd32   :  { %v685_v63 = vmul.f32 %v683_v61, %v680_v60 }
 0xd34   :  { %v688_v0 = vadd.f32 %v687_v62, %v685_v63  ;;  %v1007_v63 = vld [vmem:[%s2545_s9 + $0x8] sm:$0xff] }
 0xd36   :  { %690 = vrot.lane.b32.xlu1 %v688_v0, %s2137_s4  ;;  %v790_v20 = vrot.slane %v688_v0, 6  ;;  %v1118_v0 = vld [vmem:[%s2543_s7] sm:$0xff] }
 0xda8   :  { %v691_v1 = vpop.permute.xlu1 %690 }
 0xda9   :  { %1849 = vmatmul.mubr.msk.f32.vlgmr.msra.gmra.mrb[6].mxu0 %vm169_vm2, %v691_v1 }
 0xdaa   :  { %1975 = vmatpush3.bf16.msra.mxu0 %v2255_v5  ;;  %1870 = vmatprep.mubr.msk.f32.mxu0 %vm2134_vm1, %v2135_v11 }
 0xdab   :  { %1976 = vmatprep.subr.bf16.mxu0 %v2133_v4 }
 0xdae   :  { %1978 = vmatpush3.bf16.msra.mxu0 %v2272_v12 }
 0xe7c   :  { %v760_v2 = vpop.f32.mrb[6].mxu0 }
 0xe7d   :  { %v761_v3 = vadd.f32 %v2302_v16, %v760_v2  ;;  %v1850_v6 = vpop.f32.mrb[7].mxu0  ;;  %v1119_v2 = vld [vmem:[%s2543_s7 + $0x8] sm:$0xff] }
 0xe7e   :  { %v1985_v6 = vpack.c.bf16 %v1119_v2, %v1118_v0 }
 0xe7f   :  { %v765_v7 = vrot.slane %v761_v3, 6  ;;  %v1009_v3 = vld [vmem:[%s2545_s9 + $0x18] sm:$0xff] }
 0xe80   :  { %1986 = vmatprep.subr.bf16.mxu0 %v1985_v6 }
 0xe81   :  { %774 = vrot.lane.b32.xlu0 %v765_v7, %s2136_s23  ;;  %v767_v8 = vadd.f32 %v765_v7, %v2304_v17  ;;  %v2421_v7 = vld [vmem:[%s2565_s1] sm:$0xff] }
 0xe83   :  { %v1685_v9 = vmul.f32 -1.442695, %v767_v8 }
 0xe85   :  { %2055 = vpow2.f32 %v1685_v9 }
 0xe8f   :  { %v2056_v10 = vpop.eup %2055 }
 0xe90   :  { %v771_v5 = vadd.f32 1.0, %v2056_v10  ;;  %v2432_v10 = vld [vmem:[%s2565_s1 + $0x8] sm:$0xff] }
 0xe92   :  { %2057 = vrcp.f32 %v771_v5 }
 0xe9c   :  { %v2058_v13 = vpop.eup %2057 }
 0xe9d   :  { %v784_v21 = vsub.f32 1.0, %v2058_v13  ;;  %v792_v25 = vmul.f32 %v2058_v13, %v790_v20 }
 0xef3   :  { %v775_v14 = vpop.permute.xlu0 %774 }
 0xef4   :  { %v777_v15 = vmul.f32 %v2058_v13, %v775_v14 }
 0xef6   :  { %779 = vrot.lane.b32.xlu1 %v777_v15, %s2136_s23 }
 0xf68   :  { %v780_v12 = vpop.permute.xlu1 %779 }
 0xf69   :  { %v782_v18 = vadd.f32 %v780_v12, %v2304_v17 }
 0xf6b   :  { %2059 = vtanh.f32 %v782_v18 }
 0xf75   :  { %v2060_v19 = vpop.eup %2059 }
 0xf76   :  { %786 = vrot.lane.b32.xlu0 %v2060_v19, %s2137_s4 }
 0xfe8   :  { %v787_v23 = vpop.permute.xlu0 %786 }
 0xfe9   :  { %v789_v24 = vmul.f32 %v787_v23, %v784_v21 }
 0xfeb   :  { %v793_v26 = vadd.f32 %v792_v25, %v789_v24  ;;  %v1110_v24 = vlaneseq }
 0xfed   :  { %v795_v27 = vrot.slane %v793_v26, 2  ;;  %v896_v43 = vrot.slane %v793_v26, 6  ;;  %v1111_v25 = vshrl.u32 %v1110_v24, 7 }
 0xfef   :  { %796 = vrot.lane.b32.xlu1 %v795_v27, %s2137_s4  ;;  %v1116_v26 = vsub.s32 1, %v1111_v25  ;;  %v1112_v27 = vsub.s32 0, %v1111_v25 }
0x1061   :  { %v797_v28 = vpop.permute.xlu1 %796 }
0x1062   :  { %1860 = vmatmul.mubr.msk.f32.vlgmr.msra.gmra.mrb[6].mxu1 %vm169_vm2, %v797_v28 }
0x1063   :  { %1881 = vmatprep.mubr.msk.f32.mxu1 %vm2134_vm1, %v2135_v11 }
0x1135   :  { %v866_v29 = vpop.f32.mrb[6].mxu1 }
0x1136   :  { %v867_v30 = vadd.f32 %v2302_v16, %v866_v29  ;;  %v1861_v31 = vpop.f32.mrb[7].mxu1 }
0x1138   :  { %v871_v32 = vrot.slane %v867_v30, 4 }
0x113a   :  { %880 = vrot.lane.b32.xlu0 %v871_v32, %s2136_s23  ;;  %v873_v33 = vadd.f32 %v871_v32, %v2304_v17  ;;  %v1695_v32 = vld [vmem:[%s2544_s8] ss:$0 sm:$0xff] }
0x113c   :  { %v1687_v34 = vmul.f32 -1.442695, %v873_v33 }
0x113e   :  { %2061 = vpow2.f32 %v1687_v34 }
0x1148   :  { %v2062_v35 = vpop.eup %2061 }
0x1149   :  { %v877_v36 = vadd.f32 1.0, %v2062_v35 }
0x114b   :  { %2063 = vrcp.f32 %v877_v36 }
0x1155   :  { %v2064_v37 = vpop.eup %2063 }
0x1156   :  { %v890_v44 = vsub.f32 1.0, %v2064_v37  ;;  %v898_v46 = vmul.f32 %v2064_v37, %v896_v43 }
0x11ac   :  { %v881_v38 = vpop.permute.xlu0 %880 }
0x11ad   :  { %v883_v39 = vmul.f32 %v2064_v37, %v881_v38 }
0x11af   :  { %885 = vrot.lane.b32.xlu1 %v883_v39, %s2136_s23 }
0x1221   :  { %v886_v40 = vpop.permute.xlu1 %885 }
0x1222   :  { %v888_v41 = vadd.f32 %v886_v40, %v2304_v17 }
0x1224   :  { %2065 = vtanh.f32 %v888_v41 }
0x122e   :  { %v2066_v42 = vpop.eup %2065 }
0x122f   :  { %892 = vrot.lane.b32.xlu0 %v2066_v42, %s2137_s4 }
0x12a1   :  { %v893_v45 = vpop.permute.xlu0 %892 }
0x12a2   :  { %v895_v47 = vmul.f32 %v893_v45, %v890_v44 }
0x12a4   :  { %v899_v22 = vadd.f32 %v898_v46, %v895_v47  ;;  %v1698_v47 = vld [vmem:[%s2547_s11] ss:$0 sm:$0xff]  ;;  %s2139_s11 = smov 16  }
0x12a6   :  { %v901_v48 = vrot.slane %v899_v22, 4  ;;  %v1002_v5 = vrot.slane %v899_v22, 6 }
0x12a8   :  { %902 = vrot.lane.b32.xlu1 %v901_v48, %s2137_s4 }
0x131a   :  { %v903_v49 = vpop.permute.xlu1 %902 }
0x131b   :  { %1871 = vmatmul.mubr.msk.f32.vlgmr.msra.gmra.mrb[8].mxu0 %vm169_vm2, %v903_v49 }
0x131c   :  { %1888 = vmatprep.mubr.msk.f32.mxu0 %vm76_vm0, %v2421_v7  ;;  %1988 = vmatpush3.bf16.msra.mxu0 %v1985_v6 }
0x131d   :  { %1989 = vmatprep.subr.bf16.mxu0 %v2133_v4 }
0x131f   :  { %1889 = vmatmul.mubr.msk.f32.vlgmr.msra.gmra.mrb[10].mxu0 %vm76_vm0, %v2432_v10 }
0x1320   :  { %1895 = vmatprep.mubr.msk.f32.mxu0 %vm2134_vm1, %v2135_v11 }
0x13ee   :  { %v972_v50 = vpop.f32.mrb[8].mxu0 }
0x13ef   :  { %v973_v51 = vadd.f32 %v2302_v16, %v972_v50  ;;  %v1872_v52 = vpop.f32.mrb[9].mxu0  ;;  %v1006_v16 = vld [vmem:[%s2545_s9] sm:$0xff] }
0x13f0   :  { %v1980_v1 = vpack.c.bf16 %v1007_v63, %v1006_v16 }
0x13f1   :  { %v977_v53 = vrot.slane %v973_v51, 2 }
0x13f2   :  { %1981 = vmatpush3.bf16.msra.mxu1 %v1980_v1  ;;  %v1890_v21 = vpop.f32.mrb[10].mxu0 }
0x13f3   :  { %986 = vrot.lane.b32.xlu0 %v977_v53, %s2136_s23  ;;  %v979_v54 = vadd.f32 %v977_v53, %v2304_v17  ;;  %1982 = vmatprep.subr.bf16.mxu1 %v2133_v4  ;;  %v1192_v23 = vpop.f32.mrb[11].mxu0 }
0x13f5   :  { %v1689_v55 = vmul.f32 -1.442695, %v979_v54 }
0x13f7   :  { %2067 = vpow2.f32 %v1689_v55  ;;  %v2138_v55 = vmov 0  }
0x13f8   :  { %2017 = vset.pattern.permute.xlu1 %v2138_v55  ;;  %2016 = vset.pattern.permute.xlu0 %v2138_v55 }
0x1401   :  { %v2068_v56 = vpop.eup %2067 }
0x1402   :  { %v983_v57 = vadd.f32 1.0, %v2068_v56  ;;  %v1699_v56 = vld [vmem:[#allocation2] ss:$0 sm:$0xff] }
0x1404   :  { %2069 = vrcp.f32 %v983_v57 }
0x140e   :  { %v2070_v58 = vpop.eup %2069 }
0x140f   :  { %v996_v13 = vsub.f32 1.0, %v2070_v58  ;;  %v1004_v15 = vmul.f32 %v2070_v58, %v1002_v5 }
0x1465   :  { %v987_v59 = vpop.permute.xlu0 %986 }
0x1466   :  { %v989_v60 = vmul.f32 %v2070_v58, %v987_v59 }
0x1468   :  { %991 = vrot.lane.b32.xlu1 %v989_v60, %s2136_s23 }
0x14da   :  { %v992_v61 = vpop.permute.xlu1 %991 }
0x14db   :  { %v994_v62 = vadd.f32 %v992_v61, %v2304_v17  ;;  %v1008_v17 = vld [vmem:[%s2545_s9 + $0x10] sm:$0xff] }
0x14dc   :  { %v1983_v8 = vpack.c.bf16 %v1009_v3, %v1008_v17 }
0x14dd   :  { %2071 = vtanh.f32 %v994_v62 }
0x14de   :  { %1984 = vmatpush3.bf16.msra.mxu1 %v1983_v8 }
0x14df   :  { %1992 = vmatprep.subr.bf16.mxu1 %v2133_v4 }
0x14e7   :  { %v2072_v9 = vpop.eup %2071 }
0x14e8   :  { %998 = vrot.lane.b32.xlu0 %v2072_v9, %s2137_s4 }
0x155a   :  { %v999_v14 = vpop.permute.xlu0 %998 }
0x155b   :  { %v1001_v12 = vmul.f32 %v999_v14, %v996_v13 }
0x155d   :  { %v1005_v18 = vadd.f32 %v1004_v15, %v1001_v12 }
0x155f   :  { %v1011_v19 = vrot.slane %v1005_v18, 6 }
0x1561   :  { %1012 = vrot.lane.b32.xlu1 %v1011_v19, %s2137_s4 }
0x15d3   :  { %v1013_v20 = vpop.permute.xlu1 %1012 }
0x15d4   :  { %1882 = vmatmul.mubr.msk.f32.vlgmr.msra.gmra.mrb[8].mxu1 %vm169_vm2, %v1013_v20 }
0x15d5   :  { %1902 = vmatprep.mubr.msk.f32.mxu1 %vm2134_vm1, %v2135_v11 }
0x16a7   :  { %v2442_v28 = vpop.f32.mrb[8].mxu1 }
0x16a8   :  { %v1117_v29 = vrot.slane %v2442_v28, %v1116_v26  ;;  %v1883_v30 = vpop.f32.mrb[9].mxu1  ;;  %v1113_v31 = vrot.slane %v2442_v28, %v1112_v27 }
0x16a9   :  { %v1376_v30 = vld [vmem:[%s2549_s13 + $0x8] sm:$0xff] }
0x16aa   :  { %v1198_v33 = vadd.f32 %v1890_v21, %v1117_v29  ;;  %v1193_v34 = vadd.f32 %v1192_v23, %v1113_v31  ;;  %v1274_v29 = vld [vmem:[%s2566_s25] sm:$0x3] }
0x16ac   :  { %v1209_v35 = vadd.f32 %v1695_v32, %v1198_v33  ;;  %v1208_v36 = vadd.f32 %v1695_v32, %v1193_v34 }
0x16ae   :  { %v1697_v37 = vmul.f32 -1.442695, %v1209_v35  ;;  %v1696_v38 = vmul.f32 -1.442695, %v1208_v36 }
0x16b0   :  { %2073 = vpow2.f32 %v1697_v37 }
0x16b1   :  { %2075 = vpow2.f32 %v1696_v38 }
0x16ba   :  { %v2074_v39 = vpop.eup %2073 }
0x16bb   :  { %v2076_v40 = vpop.eup %2075  ;;  %v1219_v41 = vadd.f32 1.0, %v2074_v39 }
0x16bc   :  { %v1218_v42 = vadd.f32 1.0, %v2076_v40  ;;  %v1701_v40 = vld [vmem:[%s2550_s14] ss:$0 sm:$0xff] }
0x16bd   :  { %2077 = vrcp.f32 %v1219_v41 }
0x16be   :  { %2079 = vrcp.f32 %v1218_v42 }
0x16bf   :  { %2081 = vtanh.f32 %v1209_v35  ;;  %v1691_v35 = vld [vmem:[%s2546_s10] ss:$0 sm:$0xff] }
0x16c0   :  { %2083 = vtanh.f32 %v1208_v36 }
0x16c7   :  { %v2078_v43 = vpop.eup %2077 }
0x16c8   :  { %v2080_v44 = vpop.eup %2079  ;;  %1228 = vrot.lane.b32.xlu1 %v2078_v43, %s2137_s4 }
0x16c9   :  { %1226 = vrot.lane.b32.xlu0 %v2080_v44, %s2137_s4  ;;  %v2082_v45 = vpop.eup %2081 }
0x16ca   :  { %v2084_v22 = vpop.eup %2083 }
0x173a   :  { %v1229_v46 = vpop.permute.xlu1 %1228 }
0x173b   :  { %v1233_v48 = vmul.f32 %v2082_v45, %v1229_v46  ;;  %v1227_v49 = vpop.permute.xlu0 %1226 }
0x173c   :  { %v1232_v50 = vmul.f32 %v2084_v22, %v1227_v49  ;;  %v1474_v49 = vld [vmem:[%s2551_s15] sm:$0xff] }
0x173d   :  { %v1242_v51 = vmul.f32 %v1698_v47, %v1233_v48 }
0x173e   :  { %v1241_v52 = vmul.f32 %v1698_v47, %v1232_v50  ;;  %v1475_v50 = vld [vmem:[%s2551_s15 + $0x8] sm:$0xff] }
0x173f   :  { %v1246_v53 = vsel %vm169_vm2, %v1242_v51, 0.0  ;;  %v1476_v51 = vld [vmem:[%s2551_s15 + $0x10] sm:$0xff] }
0x1740   :  { %1247 = vadd.xlane.f32.xlu1 %v1246_v53  ;;  %v1243_v54 = vsel %vm169_vm2, %v1241_v52, 0.0  ;;  %v1996_v52 = vpack.c.bf16 %v1475_v50, %v1474_v49  ;;  %v1477_v53 = vld [vmem:[%s2551_s15 + $0x18] sm:$0xff] }
0x1741   :  { %1244 = vadd.xlane.f32.xlu0 %v1243_v54  ;;  %v1999_v54 = vpack.c.bf16 %v1477_v53, %v1476_v51 }
0x17cd   :  { %v1248_v57 = vpop.xlane.xlu1 %1247 }
0x17ce   :  { %v1257_v58 = vadd.f32 %v1699_v56, %v1248_v57  ;;  %v1245_v59 = vpop.xlane.xlu0 %1244 }
0x17cf   :  { %v1256_v60 = vadd.f32 %v1699_v56, %v1245_v59 }
0x17d0   :  { %v1260_v61 = vsel %vm1258_vm3, %v1257_v58, -inf }
0x17d1   :  { %v1259_v62 = vsel %vm1258_vm3, %v1256_v60, -inf }
0x17d2   :  { %v1261_v16 = vmax.f32 %v1259_v62, %v1260_v61 }
0x17d4   :  { %v1262_v63 = vrot.slane %v1261_v16, 4 }
0x17d6   :  { %v1263_v0 = vmax.f32 %v1261_v16, %v1262_v63  ;;  %v1572_v63 = vld [vmem:[%s2553_s17] sm:$0xff] }
0x17d8   :  { %v1264_v1 = vrot.slane %v1263_v0, 2 }
0x17da   :  { %v1265_v2 = vmax.f32 %v1263_v0, %v1264_v1  ;;  %v1573_v0 = vld [vmem:[%s2553_s17 + $0x8] sm:$0xff]  ;;  %v1574_v1 = vld [vmem:[%s2553_s17 + $0x10] sm:$0xff] }
0x17dc   :  { %v1266_v17 = vrot.slane %v1265_v2, 1 }
0x17de   :  { %v1267_v3 = vmax.f32 %v1265_v2, %v1266_v17  ;;  %v2002_v2 = vpack.c.bf16 %v1573_v0, %v1572_v63  ;;  %v1575_v17 = vld [vmem:[%s2553_s17 + $0x18] sm:$0xff] }
0x17e0   :  { %v1268_v6 = vsub.f32 %v1256_v60, %v1267_v3  ;;  %v1269_v8 = vsub.f32 %v1257_v58, %v1267_v3  ;;  %v2005_v3 = vpack.c.bf16 %v1575_v17, %v1574_v1 }
0x17e2   :  { %v1270_v9 = vmul.f32 1.442695, %v1268_v6  ;;  %v1272_v5 = vmul.f32 1.442695, %v1269_v8  ;;  %v1704_v6 = vld [vmem:[%s2552_s16] ss:$0 sm:$0xff] }
0x17e3   :  { %s2141_s16 = smov [#allocation3]  }
0x17e4   :  { %2085 = vpow2.f32 %v1270_v9  ;;  %s1663_s26 = sshll.u32 %s2141_s16, 4  ;;  %s1664_s26 = int_to_ptr.vmem [resolvable:$true] %s1663_s26 }
0x17e5   :  { %2087 = vpow2.f32 %v1272_v5  ;;  %s2109_s27 = scalar_lea.vmem %s1664_s26, 32  ;;  %p2114_p1 = scmp.lt.s32.totalorder %s1664_s26, %s1664_s26 }
0x17e6   :  { %p2110_p0 = scmp.ne.s32.totalorder %s1664_s26, %s2109_s27  ;;  %p2115_p2 = scmp.lt.s32.totalorder %s2109_s27, %s2109_s27 }
0x17e8   :  { %p2116_p3 = por %p2115_p2, %p2114_p1 }
0x17ea   :  { %p2117_p4 = pnand %p2116_p3, %p2110_p0 }
0x17ee   :  { %v2086_v13 = vpop.eup %2085 }
0x17ef   :  { %v2088_v14 = vpop.eup %2087  ;;  %1277 = vperm.xlu0 %2016, %v2086_v13  }
0x17f0   :  { %1282 = vperm.xlu1 %2017, %v2088_v14   ;;  %v2018_v15 = vpack.i.bf16 %v2088_v14, %v2086_v13 }
0x17f4   :  { %2019 = vrot.lane.b32.xlu1 %v2018_v15, %s2139_s11 }
0x186e   :  { %v1278_v18 = vpop.permute.xlu0 %1277 }
0x186f   :  { %v1283_v12 = vpop.permute.xlu1 %1282  ;;  %v1285_v21 = vmul.f32 %v1278_v18, %v2421_v7  ;;  %v2140_v7 = vmov 16  }
0x1870   :  { %v1286_v20 = vmul.f32 %v1283_v12, %v2432_v10  ;;  %2023 = vset.pattern.permute.xlu1 %v2140_v7  ;;  %2024 = vset.pattern.permute.xlu0 %v2140_v7  ;;  %v1375_v10 = vld [vmem:[%s2549_s13] sm:$0xff] }
0x1871   :  { %v1993_v31 = vpack.c.bf16 %v1376_v30, %v1375_v10 }
0x1873   :  { %v2020_v19 = vpop.permute.xlu1 %2019  ;;  %1994 = vmatpush3.bf16.msra.mxu1 %v1993_v31 }
0x1874   :  { %v2022_v23 = vunpack.i.h.bf16 %v2020_v19  ;;  %v2021_v24 = vunpack.i.l.bf16 %v2020_v19  ;;  %2001 = vmatprep.subr.bf16.mxu1 %v2133_v4 }
0x1876   :  { %v1294_v25 = vsel %vm76_vm0, %v1286_v20, %v2022_v23  ;;  %v1293_v26 = vsel %vm76_vm0, %v1285_v21, %v2021_v24  ;;  %v1707_v20 = vld [vmem:[%s2554_s18] ss:$0 sm:$0xff] }
0x1877   :  { %v1990_v27 = vpack.c.bf16 %v1294_v25, %v1293_v26 }
0x1879   :  { %1991 = vmatpush3.bf16.msra.mxu0 %v1990_v27 }
0x187a   :  { %1995 = vmatprep.subr.bf16.mxu0 %v2133_v4 }
0x187c   :  { %1896 = vmatmul.mubr.msk.f32.vlgmr.msra.gmra.mrb[12].mxu0 %vm76_vm0, %v1274_v29 }
0x187d   :  { %1913 = vmatprep.mubr.msk.f32.mxu0 %vm2134_vm1, %v2135_v11  ;;  %1997 = vmatpush3.bf16.msra.mxu0 %v1996_v52 }
0x187e   :  { %1998 = vmatprep.subr.bf16.mxu0 %v2133_v4 }
0x1881   :  { %2000 = vmatpush3.bf16.msra.mxu0 %v1999_v54 }
0x194f   :  { %v1364_v32 = vpop.f32.mrb[12].mxu0 }
0x1950   :  { %2089 = vrcp.f32 %v1364_v32  ;;  %v1897_v33 = vpop.f32.mrb[13].mxu0 }
0x195a   :  { %v2090_v34 = vpop.eup %2089 }
0x195b   :  { %1371 = vperm.xlu1 %2023, %v2090_v34  }
0x195f   :  { %1092 = vrot.lane.b32.xlu1 %v1691_v35, %s2136_s23 }
0x19da   :  { %v1372_v36 = vpop.permute.xlu1 %1371 }
0x19db   :  { %v1374_v37 = vmul.f32 %v1372_v36, %v1364_v32 }
0x19dd   :  { %1903 = vmatmul.mubr.msk.f32.vlgmr.msra.gmra.mrb[10].mxu1 %vm76_vm0, %v1374_v37 }
0x19de   :  { %1924 = vmatprep.mubr.msk.f32.mxu1 %vm2134_vm1, %v2135_v11  ;;  %v1093_v38 = vpop.permute.xlu1 %1092  ;;  %2003 = vmatpush3.bf16.msra.mxu1 %v2002_v2 }
0x19df   :  { %v1095_v39 = vadd.f32 %v1093_v38, %v2442_v28  ;;  %2004 = vmatprep.subr.bf16.mxu1 %v2133_v4 }
0x19e1   :  { %v1692_v41 = vmul.f32 -1.442695, %v1095_v39 }
0x19e2   :  { %2006 = vmatpush3.bf16.msra.mxu1 %v2005_v3 }
0x19e3   :  { %2091 = vpow2.f32 %v1692_v41 }
0x19ed   :  { %v2092_v46 = vpop.eup %2091 }
0x19ee   :  { %v1100_v48 = vadd.f32 1.0, %v2092_v46 }
0x1ab0   :  { %v1453_v42 = vpop.f32.mrb[10].mxu1 }
0x1ab1   :  { %v1454_v43 = vadd.f32 %v1701_v40, %v1453_v42  ;;  %v1904_v44 = vpop.f32.mrb[11].mxu1 }
0x1ab3   :  { %v1703_v45 = vmul.f32 -1.442695, %v1454_v43 }
0x1ab5   :  { %2093 = vpow2.f32 %v1703_v45 }
0x1abf   :  { %v2094_v47 = vpop.eup %2093 }
0x1ac0   :  { %v1461_v22 = vadd.f32 1.0, %v2094_v47 }
0x1ac2   :  { %2095 = vrcp.f32 %v1461_v22 }
0x1ac3   :  { %2097 = vrcp.f32 %v1100_v48 }
0x1ac4   :  { %2099 = vtanh.f32 %v1454_v43 }
0x1ac5   :  { %2101 = vtanh.f32 %v1095_v39 }
0x1acc   :  { %v2096_v11 = vpop.eup %2095 }
0x1acd   :  { %1465 = vrot.lane.b32.xlu1 %v2096_v11, %s2137_s4  ;;  %v2098_v28 = vpop.eup %2097 }
0x1ace   :  { %v2100_v55 = vpop.eup %2099 }
0x1acf   :  { %v2102_v59 = vpop.eup %2101 }
0x1ad1   :  { %1104 = vrot.lane.b32.xlu1 %v2098_v28, %s2137_s4 }
0x1b3f   :  { %v1466_v56 = vpop.permute.xlu1 %1465 }
0x1b40   :  { %v1468_v57 = vmul.f32 %v2100_v55, %v1466_v56 }
0x1b42   :  { %1470 = vrot.lane.b32.xlu1 %v1468_v57, %s2136_s23 }
0x1b43   :  { %v1105_v58 = vpop.permute.xlu1 %1104 }
0x1b44   :  { %v1107_v60 = vmul.f32 %v2102_v59, %v1105_v58 }
0x1bb4   :  { %v1471_v61 = vpop.permute.xlu1 %1470 }
0x1bb5   :  { %v1473_v62 = vmul.f32 %v1471_v61, %v1107_v60 }
0x1bb7   :  { %1486 = vrot.lane.b32.xlu0 %v1473_v62, %s2136_s23 }
0x1c29   :  { %v1487_v16 = vpop.permute.xlu0 %1486 }
0x1c2a   :  { %1914 = vmatmul.mubr.msk.f32.vlgmr.msra.gmra.mrb[14].mxu0 %vm169_vm2, %v1487_v16 }
0x1cfd   :  { %v1556_v8 = vpop.f32.mrb[14].mxu0 }
0x1cfe   :  { %v1557_v9 = vadd.f32 %v1704_v6, %v1556_v8  ;;  %v1915_v5 = vpop.f32.mrb[15].mxu0 }
0x1d00   :  { %v1706_v13 = vmul.f32 -1.442695, %v1557_v9 }
0x1d02   :  { %2103 = vpow2.f32 %v1706_v13 }
0x1d0c   :  { %v2104_v14 = vpop.eup %2103 }
0x1d0d   :  { %v1564_v15 = vadd.f32 1.0, %v2104_v14 }
0x1d0f   :  { %2105 = vrcp.f32 %v1564_v15 }
0x1d10   :  { %2107 = vtanh.f32 %v1557_v9 }
0x1d19   :  { %v2106_v12 = vpop.eup %2105 }
0x1d1a   :  { %1568 = vrot.lane.b32.xlu1 %v2106_v12, %s2137_s4  ;;  %v2108_v18 = vpop.eup %2107 }
0x1d8c   :  { %v1569_v19 = vpop.permute.xlu1 %1568 }
0x1d8d   :  { %v1571_v4 = vmul.f32 %v2108_v18, %v1569_v19 }
0x1d8f   :  { %1925 = vmatmul.mubr.msk.f32.vlgmr.msra.gmra.mrb[12].mxu1 %vm169_vm2, %v1571_v4 }
0x1e62   :  { %v1652_v21 = vpop.f32.mrb[12].mxu1 }
0x1e63   :  { %v1653_v23 = vadd.f32 %v1707_v20, %v1652_v21  ;;  %v1926_v24 = vpop.f32.mrb[13].mxu1 }
0x1e65   :  { %1656 = vst [vmem:[#allocation3] sm:$0x3] %v1653_v23 }
0x1e66   :  { %2120 = shalt.err (!%p2117_p4)
}
0x1e67   :  { %s2121_s29 = scalar_lea.hbm %s2555_s19, 32 }
0x1e68   :  { %p2122_p5 = scmp.ne.s32.totalorder %s2555_s19, %s2121_s29  ;;  %p2125_p6 = scmp.lt.u32.totalorder %s2121_s29, %s2555_s19 }
0x1e6a   :  { %p2127_p7 = pnand %p2125_p6, %p2122_p5 }
0x1e6c   :  { %2130 = shalt.err (!%p2127_p7)
}
0x1e6d   :  { %1666 = dma.vmem_to_hbm [thread:$0]  %s1664_s26, 32, %s2555_s19, [#allocation4]  }
0x1e6e   :  { %2131 = dma.done.wait [#allocation4], 32  }
0x1e6f   :  { %2132 = vsyncadd [#allocation4], 4294967264 }
0x1e70   :  { %1670 = vsyncpa [#allocation4], 1 }

</bundles_post_ra>
